<compile_context>
chip_gen: v6e
topology: v6e:2x2x1
jax: 0.10.0
libtpu: 0.0.40
codegen_flags: <defaults>
</compile_context>

<pallas_src>
import numpy as np
import jax
import jax.numpy as jnp
from jax import lax
from jax.experimental import pallas as pl
from jax.experimental.pallas import tpu as pltpu

LANE = 128      # vreg lane width
SUBLANE = 8     # f32 vreg sublane count
EPS2 = 1e-16    # rsqrt(n2 + EPS2) ~ 1/(||q|| + 1e-8) for well-formed quats


# ---------------------------------------------------------------------------
# Skeleton topology helpers (mirrors the module __init__)
# ---------------------------------------------------------------------------
def build_bfs_order(parents):
    num_joints = len(parents)
    children = {i: [] for i in range(num_joints)}
    for j, p in enumerate(parents):
        if p != -1 and p < num_joints:
            children[p].append(j)
    order, q, visited, head = [], [0], {0}, 0
    while head < len(q):
        cur = q[head]
        head += 1
        order.append(cur)
        for c in children.get(cur, []):
            if c not in visited:
                visited.add(c)
                q.append(c)
    return order


def _topology(parents, bfs_order=None):
    parents = [int(p) for p in parents]
    J = len(parents)
    if bfs_order is None:
        bfs_order = build_bfs_order(parents)
    bfs_order = [int(j) for j in bfs_order]
    child_count = {j: 0 for j in range(J)}
    for j in bfs_order:
        p = parents[j]
        if p != -1:
            child_count[p] += 1
    # local_q is only consumed for non-root joints that themselves have
    # children (leaf orientations are never read by anything downstream).
    needed_local = [j for j in bfs_order if parents[j] != -1 and child_count[j] > 0]
    local_row = {j: r for r, j in enumerate(needed_local)}
    return parents, bfs_order, child_count, needed_local, local_row


# ---------------------------------------------------------------------------
# Trace-time constant folding helpers for the rest-direction rotation
# (rest_dirs are Python constants; XLA will not fold x*0.0 under f32).
# ---------------------------------------------------------------------------
def _cxv(c, v):
    if c == 0.0:
        return None
    if c == 1.0:
        return v
    if c == -1.0:
        return -v
    return c * v


def _vadd(a, b):
    if a is None:
        return b
    if b is None:
        return a
    return a + b


def _vsub(a, b):
    if a is None:
        return None if b is None else -b
    if b is None:
        return a
    return a - b


def _vmul(a, b):
    if a is None or b is None:
        return None
    return a * b


def _fma_pos(pp, rd_c, rv, bl):
    # parent_pos + (rest_const + rotated_var) * bone_length, folded
    if rv is None:
        if rd_c == 0.0:
            return pp
        return pp + rd_c * bl
    if rd_c == 0.0:
        return pp + rv * bl
    return pp + (rd_c + rv) * bl


# ---------------------------------------------------------------------------
# Pallas kernel (topology baked in at trace time)
# ---------------------------------------------------------------------------
def _make_fk_kernel(parents, bfs_order, rest_dirs, child_count, local_row,
                    num_joints):
    parents = [int(p) for p in parents]
    bfs_order = [int(j) for j in bfs_order]
    rest_dirs = [tuple(float(v) for v in rd) for rd in np.asarray(rest_dirs)]
    unreached = sorted(set(range(num_joints)) - set(bfs_order))

    def kernel(root_q_ref, root_p_ref, local_q_ref, bone_ref, out_ref):
        tile_bsub = out_ref.shape[2]
        n_sub = tile_bsub // SUBLANE

        def process(base):
            """FK walk for one 8-sublane sub-slice of the batch tile.
            Keeps every live quat/pos slab exactly one vreg."""
            sl = pl.ds(base, SUBLANE)
            zeros = jnp.zeros((SUBLANE, LANE), jnp.float32)

            # ---- root: normalize global orientation, place root position ----
            rw = root_q_ref[0, sl, :]
            rx = root_q_ref[1, sl, :]
            ry = root_q_ref[2, sl, :]
            rz = root_q_ref[3, sl, :]
            rinv = lax.rsqrt(rw * rw + rx * rx + ry * ry + rz * rz + EPS2)
            quat = {0: (rw * rinv, rx * rinv, ry * rinv, rz * rinv)}
            px = root_p_ref[0, sl, :]
            py = root_p_ref[1, sl, :]
            pz = root_p_ref[2, sl, :]
            pos = {0: (px, py, pz)}
            out_ref[0, 0, sl, :] = px
            out_ref[0, 1, sl, :] = py
            out_ref[0, 2, sl, :] = pz

            remaining = dict(child_count)

            # ---- BFS walk (unrolled; frontier lives in registers) ----
            for j in bfs_order:
                if j == 0:
                    continue
                p = parents[j]
                if p == -1:
                    # Secondary root: the torch module leaves its global pos /
                    # quat at their zero initialization.
                    out_ref[j, 0, sl, :] = zeros
                    out_ref[j, 1, sl, :] = zeros
                    out_ref[j, 2, sl, :] = zeros
                    quat[j] = (zeros, zeros, zeros, zeros)
                    pos[j] = (zeros, zeros, zeros)
                    continue
                if p not in quat:
                    # Defensive (noncanonical BFS order): torch would read the
                    # zero-initialized buffers here.
                    quat[p] = (zeros, zeros, zeros, zeros)
                    pos[p] = (zeros, zeros, zeros)

                qw_p, qx_p, qy_p, qz_p = quat[p]
                ppx, ppy, ppz = pos[p]

                has_kids = child_count.get(j, 0) > 0
                if has_kids:
                    # child local rotation, normalized via one rsqrt (EUP)
                    row = local_row[j]
                    cw = local_q_ref[row, 0, sl, :]
                    cx = local_q_ref[row, 1, sl, :]
                    cy = local_q_ref[row, 2, sl, :]
                    cz = local_q_ref[row, 3, sl, :]
                    cinv = lax.rsqrt(cw * cw + cx * cx + cy * cy + cz * cz + EPS2)
                    qw_c, qx_c, qy_c, qz_c = cw * cinv, cx * cinv, cy * cinv, cz * cinv

                    # global orientation = parent_global x child_local
                    nw = qw_p * qw_c - qx_p * qx_c - qy_p * qy_c - qz_p * qz_c
                    nx = qw_p * qx_c + qx_p * qw_c + qy_p * qz_c - qz_p * qy_c
                    ny = qw_p * qy_c - qx_p * qz_c + qy_p * qw_c + qz_p * qx_c
                    nz = qw_p * qz_c + qx_p * qy_c - qy_p * qx_c + qz_p * qw_c

                # rotate (constant) rest direction by PARENT global quat:
                #   t = 2 * qv x r ; rotated = r + qw*t + qv x t
                rdx, rdy, rdz = rest_dirs[j]
                t_x = _vadd(_cxv(2.0 * rdz, qy_p), _cxv(-2.0 * rdy, qz_p))
                t_y = _vadd(_cxv(2.0 * rdx, qz_p), _cxv(-2.0 * rdz, qx_p))
                t_z = _vadd(_cxv(2.0 * rdy, qx_p), _cxv(-2.0 * rdx, qy_p))
                rvx = _vadd(_vmul(qw_p, t_x), _vsub(_vmul(qy_p, t_z), _vmul(qz_p, t_y)))
                rvy = _vadd(_vmul(qw_p, t_y), _vsub(_vmul(qz_p, t_x), _vmul(qx_p, t_z)))
                rvz = _vadd(_vmul(qw_p, t_z), _vsub(_vmul(qx_p, t_y), _vmul(qy_p, t_x)))

                bl = bone_ref[j, sl, :]
                jx = _fma_pos(ppx, rdx, rvx, bl)
                jy = _fma_pos(ppy, rdy, rvy, bl)
                jz = _fma_pos(ppz, rdz, rvz, bl)
                out_ref[j, 0, sl, :] = jx
                out_ref[j, 1, sl, :] = jy
                out_ref[j, 2, sl, :] = jz

                if has_kids:
                    quat[j] = (nw, nx, ny, nz)
                    pos[j] = (jx, jy, jz)

                # drop parent from the live frontier once all children are done
                remaining[p] = remaining.get(p, 1) - 1
                if remaining[p] <= 0:
                    quat.pop(p, None)
                    pos.pop(p, None)

        if n_sub == 1:
            process(0)
        else:
            def body(i, carry):
                base = pl.multiple_of(i * SUBLANE, SUBLANE)
                process(base)
                return carry
            lax.fori_loop(0, n_sub, body, 0, unroll=True)

        # Joints never reached from the root keep zero positions (matches the
        # torch module's zero-initialized global_positions).
        if unreached:
            zeros_full = jnp.zeros(out_ref.shape[2:], out_ref.dtype)
            for j in unreached:
                out_ref[j, 0] = zeros_full
                out_ref[j, 1] = zeros_full
                out_ref[j, 2] = zeros_full

    return kernel


# ---------------------------------------------------------------------------
# Tile selection: big tiles (amortize grid-step overhead) but bounded VMEM,
# and >= 2 grid steps when the batch allows (v7x megacore).
# ---------------------------------------------------------------------------
def _choose_tile_bsub(bsub, n_slabs):
    per_row_bytes = n_slabs * LANE * 4
    budget = 20 << 20                          # target for double-buffered tiles
    cap = (budget // (2 * per_row_bytes)) // SUBLANE * SUBLANE
    cap = int(max(SUBLANE, min(64, cap)))
    if bsub > SUBLANE:
        half = ((bsub + 1) // 2 + SUBLANE - 1) // SUBLANE * SUBLANE
        cap = min(cap, max(SUBLANE, half))
    tile = SUBLANE
    t = SUBLANE
    while t <= min(cap, bsub):
        if bsub % t == 0:
            tile = t
        t += SUBLANE
    return tile


# ---------------------------------------------------------------------------
# Native entry point: joint-major, batch-last layout end-to-end (no HBM
# transposes around the kernel).
#   root_q_t   : (4, bsub, 128)
#   root_p_t   : (3, bsub, 128)
#   local_nl_t : (n_local, 4, bsub, 128)  -- compacted to non-root joints
#                that have children, in BFS-needed order
#   bone_t     : (J, bsub, 128)
# Returns (J, 3, bsub, 128).
# ---------------------------------------------------------------------------
def forward_kinematics_pallas_native(root_q_t, root_p_t, local_nl_t, bone_t,
                                     parents, rest_dirs, bfs_order=None):
    parents_l, order, child_count, needed_local, local_row = _topology(parents, bfs_order)
    J = len(parents_l)
    bsub = bone_t.shape[1]
    if bsub % SUBLANE != 0:
        raise ValueError(f"batch sublane extent {bsub} must be a multiple of {SUBLANE}")
    n_local = local_nl_t.shape[0]

    n_slabs = 4 + 3 + 4 * n_local + J + 3 * J
    tile = _choose_tile_bsub(bsub, n_slabs)
    per_tile_bytes = n_slabs * tile * LANE * 4
    vmem_limit = int(min(max(4 * per_tile_bytes + (4 << 20), 16 << 20), 48 << 20))

    kernel = _make_fk_kernel(parents_l, order, rest_dirs, child_count,
                             local_row, J)

    grid = (bsub // tile,)
    out = pl.pallas_call(
        kernel,
        out_shape=jax.ShapeDtypeStruct((J, 3, bsub, LANE), jnp.float32),
        grid=grid,
        in_specs=[
            pl.BlockSpec((4, tile, LANE), lambda b: (0, b, 0)),
            pl.BlockSpec((3, tile, LANE), lambda b: (0, b, 0)),
            pl.BlockSpec((n_local, 4, tile, LANE), lambda b: (0, 0, b, 0)),
            pl.BlockSpec((J, tile, LANE), lambda b: (0, b, 0)),
        ],
        out_specs=pl.BlockSpec((J, 3, tile, LANE), lambda b: (0, 0, b, 0)),
        compiler_params=pltpu.CompilerParams(
            dimension_semantics=("parallel",),
            vmem_limit_bytes=vmem_limit),
    )(root_q_t, root_p_t, local_nl_t, bone_t)
    return out


# ---------------------------------------------------------------------------
# PyTorch-compatible wrapper: same convention as the nn.Module forward.
#   root_q (B,4), root_p (B,3), local_q (B,J,4), bone_lengths (B,J) -> (B,J,3)
# ---------------------------------------------------------------------------
def forward_kinematics_pallas(root_orientation_quat, root_position,
                              local_joint_rotations_quat, bone_lengths,
                              parents, rest_dirs, bfs_order=None):
    parents_l, order, child_count, needed_local, local_row = _topology(parents, bfs_order)
    J = len(parents_l)

    root_q = jnp.asarray(root_orientation_quat, jnp.float32)
    root_p = jnp.asarray(root_position, jnp.float32)
    local_q = jnp.asarray(local_joint_rotations_quat, jnp.float32)
    bone = jnp.asarray(bone_lengths, jnp.float32)
    B = root_p.shape[0]

    bsub = pl.cdiv(B, LANE)
    bsub_p = ((bsub + SUBLANE - 1) // SUBLANE) * SUBLANE
    Bp = bsub_p * LANE
    pad = Bp - B
    if pad:
        # Padded lanes hold zeros; they compute harmless finite values
        # (rsqrt(eps) * 0 = 0) and are sliced off at the end.
        root_q = jnp.pad(root_q, ((0, pad), (0, 0)))
        root_p = jnp.pad(root_p, ((0, pad), (0, 0)))
        local_q = jnp.pad(local_q, ((0, pad), (0, 0), (0, 0)))
        bone = jnp.pad(bone, ((0, pad), (0, 0)))

    # Compact local_q to the rows that are actually consumed (non-root joints
    # with children); leaves/root never read their local rotation, so their
    # bytes are never DMA'd into the kernel.
    if needed_local:
        local_nl = local_q[:, np.asarray(needed_local, np.int32), :]
    else:
        local_nl = local_q[:, :1, :]          # dummy row, never read
    n_local = local_nl.shape[1]

    # TODO(synk): the transposes below (and the output de-transpose) are pure
    # layout glue, each a full HBM round trip; callers that can produce /
    # consume the joint-major batch-last (J, C, bsub, 128) layout should call
    # forward_kinematics_pallas_native directly and skip them.
    root_q_t = root_q.T.reshape(4, bsub_p, LANE)
    root_p_t = root_p.T.reshape(3, bsub_p, LANE)
    local_t = jnp.transpose(local_nl, (1, 2, 0)).reshape(n_local, 4, bsub_p, LANE)
    bone_t = bone.T.reshape(J, bsub_p, LANE)

    out = forward_kinematics_pallas_native(root_q_t, root_p_t, local_t, bone_t,
                                           parents_l, rest_dirs, order)
    out = out.reshape(J, 3, Bp)
    out = jnp.transpose(out, (2, 0, 1))[:B]   # (B, J, 3)
    return out


# ---------------------------------------------------------------------------
# Pure-numpy reference (mirrors the PyTorch forward exactly)
# ---------------------------------------------------------------------------
def fk_reference(root_q, root_p, local_q, bone_lengths, parents, bfs_order, rest_dirs):
    root_q = np.asarray(root_q, np.float32)
    root_p = np.asarray(root_p, np.float32)
    local_q = np.asarray(local_q, np.float32)
    bone_lengths = np.asarray(bone_lengths, np.float32)
    rest_dirs = np.asarray(rest_dirs, np.float32)
    B, J = bone_lengths.shape

    rqn = root_q / (np.linalg.norm(root_q, axis=-1, keepdims=True) + 1e-8)
    lqn = local_q / (np.linalg.norm(local_q, axis=-1, keepdims=True) + 1e-8)

    pos = np.zeros((B, J, 3), np.float32)
    gq = np.zeros((B, J, 4), np.float32)
    pos[:, 0] = root_p
    gq[:, 0] = rqn

    for j in bfs_order:
        p = parents[j]
        if p == -1:
            continue
        pq = gq[:, p]
        cq = lqn[:, j]
        qw_p, qx_p, qy_p, qz_p = pq[:, 0], pq[:, 1], pq[:, 2], pq[:, 3]
        qw_c, qx_c, qy_c, qz_c = cq[:, 0], cq[:, 1], cq[:, 2], cq[:, 3]
        nw = qw_p * qw_c - qx_p * qx_c - qy_p * qy_c - qz_p * qz_c
        nx = qw_p * qx_c + qx_p * qw_c + qy_p * qz_c - qz_p * qy_c
        ny = qw_p * qy_c - qx_p * qz_c + qy_p * qw_c + qz_p * qx_c
        nz = qw_p * qz_c + qx_p * qy_c - qy_p * qx_c + qz_p * qw_c
        gq[:, j] = np.stack([nw, nx, ny, nz], -1)

        r = np.broadcast_to(rest_dirs[j][None, :], (B, 3))
        qv = pq[:, 1:]
        t = 2.0 * np.cross(qv, r)
        rot = r + pq[:, 0:1] * t + np.cross(qv, t)
        pos[:, j] = pos[:, p] + rot * bone_lengths[:, j:j + 1]
    return pos


# ---------------------------------------------------------------------------
if __name__ == "__main__":
    # Small synthetic skeleton: 8 joints, 3 chains off the root.
    parents = [-1, 0, 1, 2, 0, 4, 0, 6]
    num_joints = len(parents)
    bfs_order = build_bfs_order(parents)

    # Rest directions ("buffer" from __init__): unit vectors, root gets zeros.
    raw_dirs = np.array(
        [[0.0, 0.0, 0.0],
         [0.0, 1.0, 0.0],
         [0.2, 0.9, 0.1],
         [0.0, 0.8, -0.3],
         [1.0, 0.1, 0.0],
         [0.9, -0.2, 0.1],
         [-1.0, 0.1, 0.0],
         [-0.9, -0.2, 0.1]], dtype=np.float32)
    norms = np.linalg.norm(raw_dirs, axis=-1, keepdims=True)
    norms[0] = 1.0
    rest_dirs = (raw_dirs / norms).astype(np.float32)

    key = jax.random.PRNGKey(0)

    def run_case(B):
        J = num_joints
        k1, k2, k3, k4 = jax.random.split(jax.random.fold_in(key, B), 4)
        root_orientation_quat = jax.random.normal(k1, (B, 4), jnp.float32)
        root_position = jax.random.normal(k2, (B, 3), jnp.float32)
        local_joint_rotations_quat = jax.random.normal(k3, (B, J, 4), jnp.float32)
        bone_lengths = jnp.abs(jax.random.normal(k4, (B, J), jnp.float32)) + 0.1

        out = forward_kinematics_pallas(
            root_orientation_quat, root_position,
            local_joint_rotations_quat, bone_lengths,
            parents, rest_dirs, bfs_order)
        out = jax.block_until_ready(out)

        ref = fk_reference(
            np.asarray(root_orientation_quat), np.asarray(root_position),
            np.asarray(local_joint_rotations_quat), np.asarray(bone_lengths),
            parents, bfs_order, rest_dirs)
        np.testing.assert_allclose(np.asarray(out), ref, rtol=1e-4, atol=1e-4)

    # Small case (single tile) and a larger case that exercises the multi
    # grid-step path and the inner 8-sublane sub-slice loop.
    run_case(4)
    run_case(4096)
    print("KERNEL_OK")
</pallas_src>

<mosaic_0001>
module attributes {stable_mosaic.version = 11 : i64} {
  func.func @kernel(%arg0: i32, %arg1: memref<4x8x128xf32, #tpu.memory_space<vmem>>, %arg2: memref<3x8x128xf32, #tpu.memory_space<vmem>>, %arg3: memref<4x4x8x128xf32, #tpu.memory_space<vmem>>, %arg4: memref<8x8x128xf32, #tpu.memory_space<vmem>>, %arg5: memref<8x3x8x128xf32, #tpu.memory_space<vmem>>) attributes {dimension_semantics = [#tpu.dimension_semantics<parallel>], iteration_bounds = array<i64: 1>, scalar_prefetch = 0 : i64, scratch_operands = 0 : i64, tpu.core_type = #tpu.core_type<tc>, window_params = [{transform_indices = @transform_0, window_bounds = array<i64: 4, 8, 128>}, {transform_indices = @transform_1, window_bounds = array<i64: 3, 8, 128>}, {transform_indices = @transform_2, window_bounds = array<i64: 4, 4, 8, 128>}, {transform_indices = @transform_3, window_bounds = array<i64: 8, 8, 128>}, {transform_indices = @transform_4, window_bounds = array<i64: 8, 3, 8, 128>}]} {
    %c0 = arith.constant 0 : index
    %c0_0 = arith.constant 0 : index
    %c0_1 = arith.constant 0 : index
    %0 = vector.load %arg1[%c0, %c0_0, %c0_1] : memref<4x8x128xf32, #tpu.memory_space<vmem>>, vector<1x8x128xf32>
    %1 = vector.shape_cast %0 : vector<1x8x128xf32> to vector<8x128xf32>
    %c1 = arith.constant 1 : index
    %c0_2 = arith.constant 0 : index
    %c0_3 = arith.constant 0 : index
    %2 = vector.load %arg1[%c1, %c0_2, %c0_3] : memref<4x8x128xf32, #tpu.memory_space<vmem>>, vector<1x8x128xf32>
    %3 = vector.shape_cast %2 : vector<1x8x128xf32> to vector<8x128xf32>
    %c2 = arith.constant 2 : index
    %c0_4 = arith.constant 0 : index
    %c0_5 = arith.constant 0 : index
    %4 = vector.load %arg1[%c2, %c0_4, %c0_5] : memref<4x8x128xf32, #tpu.memory_space<vmem>>, vector<1x8x128xf32>
    %5 = vector.shape_cast %4 : vector<1x8x128xf32> to vector<8x128xf32>
    %c3 = arith.constant 3 : index
    %c0_6 = arith.constant 0 : index
    %c0_7 = arith.constant 0 : index
    %6 = vector.load %arg1[%c3, %c0_6, %c0_7] : memref<4x8x128xf32, #tpu.memory_space<vmem>>, vector<1x8x128xf32>
    %7 = vector.shape_cast %6 : vector<1x8x128xf32> to vector<8x128xf32>
    %8 = arith.mulf %1, %1 : vector<8x128xf32>
    %9 = arith.mulf %3, %3 : vector<8x128xf32>
    %10 = arith.addf %8, %9 : vector<8x128xf32>
    %11 = arith.mulf %5, %5 : vector<8x128xf32>
    %12 = arith.addf %10, %11 : vector<8x128xf32>
    %13 = arith.mulf %7, %7 : vector<8x128xf32>
    %14 = arith.addf %12, %13 : vector<8x128xf32>
    %cst = arith.constant 1.000000e-16 : f32
    %15 = vector.broadcast %cst : f32 to vector<8x128xf32>
    %16 = arith.addf %14, %15 : vector<8x128xf32>
    %17 = math.rsqrt %16 : vector<8x128xf32>
    %18 = arith.mulf %1, %17 : vector<8x128xf32>
    %19 = arith.mulf %3, %17 : vector<8x128xf32>
    %20 = arith.mulf %5, %17 : vector<8x128xf32>
    %21 = arith.mulf %7, %17 : vector<8x128xf32>
    %c0_8 = arith.constant 0 : index
    %c0_9 = arith.constant 0 : index
    %c0_10 = arith.constant 0 : index
    %22 = vector.load %arg2[%c0_8, %c0_9, %c0_10] : memref<3x8x128xf32, #tpu.memory_space<vmem>>, vector<1x8x128xf32>
    %23 = vector.shape_cast %22 : vector<1x8x128xf32> to vector<8x128xf32>
    %c1_11 = arith.constant 1 : index
    %c0_12 = arith.constant 0 : index
    %c0_13 = arith.constant 0 : index
    %24 = vector.load %arg2[%c1_11, %c0_12, %c0_13] : memref<3x8x128xf32, #tpu.memory_space<vmem>>, vector<1x8x128xf32>
    %25 = vector.shape_cast %24 : vector<1x8x128xf32> to vector<8x128xf32>
    %c2_14 = arith.constant 2 : index
    %c0_15 = arith.constant 0 : index
    %c0_16 = arith.constant 0 : index
    %26 = vector.load %arg2[%c2_14, %c0_15, %c0_16] : memref<3x8x128xf32, #tpu.memory_space<vmem>>, vector<1x8x128xf32>
    %27 = vector.shape_cast %26 : vector<1x8x128xf32> to vector<8x128xf32>
    %c0_17 = arith.constant 0 : index
    %c0_18 = arith.constant 0 : index
    %c0_19 = arith.constant 0 : index
    %c0_20 = arith.constant 0 : index
    %28 = vector.load %arg5[%c0_17, %c0_18, %c0_19, %c0_20] : memref<8x3x8x128xf32, #tpu.memory_space<vmem>>, vector<1x1x8x128xf32>
    %29 = vector.shape_cast %28 : vector<1x1x8x128xf32> to vector<8x128xf32>
    %30 = vector.shape_cast %23 : vector<8x128xf32> to vector<1x1x8x128xf32>
    tpu.vector_store %arg5[%c0_17, %c0_18, %c0_19, %c0_20], %30 {strides = array<i32>} : memref<8x3x8x128xf32, #tpu.memory_space<vmem>>, vector<1x1x8x128xf32>,
    %c0_21 = arith.constant 0 : index
    %c1_22 = arith.constant 1 : index
    %c0_23 = arith.constant 0 : index
    %c0_24 = arith.constant 0 : index
    %31 = vector.load %arg5[%c0_21, %c1_22, %c0_23, %c0_24] : memref<8x3x8x128xf32, #tpu.memory_space<vmem>>, vector<1x1x8x128xf32>
    %32 = vector.shape_cast %31 : vector<1x1x8x128xf32> to vector<8x128xf32>
    %33 = vector.shape_cast %25 : vector<8x128xf32> to vector<1x1x8x128xf32>
    tpu.vector_store %arg5[%c0_21, %c1_22, %c0_23, %c0_24], %33 {strides = array<i32>} : memref<8x3x8x128xf32, #tpu.memory_space<vmem>>, vector<1x1x8x128xf32>,
    %c0_25 = arith.constant 0 : index
    %c2_26 = arith.constant 2 : index
    %c0_27 = arith.constant 0 : index
    %c0_28 = arith.constant 0 : index
    %34 = vector.load %arg5[%c0_25, %c2_26, %c0_27, %c0_28] : memref<8x3x8x128xf32, #tpu.memory_space<vmem>>, vector<1x1x8x128xf32>
    %35 = vector.shape_cast %34 : vector<1x1x8x128xf32> to vector<8x128xf32>
    %36 = vector.shape_cast %27 : vector<8x128xf32> to vector<1x1x8x128xf32>
    tpu.vector_store %arg5[%c0_25, %c2_26, %c0_27, %c0_28], %36 {strides = array<i32>} : memref<8x3x8x128xf32, #tpu.memory_space<vmem>>, vector<1x1x8x128xf32>,
    %c0_29 = arith.constant 0 : index
    %c0_30 = arith.constant 0 : index
    %c0_31 = arith.constant 0 : index
    %c0_32 = arith.constant 0 : index
    %37 = vector.load %arg3[%c0_29, %c0_30, %c0_31, %c0_32] : memref<4x4x8x128xf32, #tpu.memory_space<vmem>>, vector<1x1x8x128xf32>
    %38 = vector.shape_cast %37 : vector<1x1x8x128xf32> to vector<8x128xf32>
    %c0_33 = arith.constant 0 : index
    %c1_34 = arith.constant 1 : index
    %c0_35 = arith.constant 0 : index
    %c0_36 = arith.constant 0 : index
    %39 = vector.load %arg3[%c0_33, %c1_34, %c0_35, %c0_36] : memref<4x4x8x128xf32, #tpu.memory_space<vmem>>, vector<1x1x8x128xf32>
    %40 = vector.shape_cast %39 : vector<1x1x8x128xf32> to vector<8x128xf32>
    %c0_37 = arith.constant 0 : index
    %c2_38 = arith.constant 2 : index
    %c0_39 = arith.constant 0 : index
    %c0_40 = arith.constant 0 : index
    %41 = vector.load %arg3[%c0_37, %c2_38, %c0_39, %c0_40] : memref<4x4x8x128xf32, #tpu.memory_space<vmem>>, vector<1x1x8x128xf32>
    %42 = vector.shape_cast %41 : vector<1x1x8x128xf32> to vector<8x128xf32>
    %c0_41 = arith.constant 0 : index
    %c3_42 = arith.constant 3 : index
    %c0_43 = arith.constant 0 : index
    %c0_44 = arith.constant 0 : index
    %43 = vector.load %arg3[%c0_41, %c3_42, %c0_43, %c0_44] : memref<4x4x8x128xf32, #tpu.memory_space<vmem>>, vector<1x1x8x128xf32>
    %44 = vector.shape_cast %43 : vector<1x1x8x128xf32> to vector<8x128xf32>
    %45 = arith.mulf %38, %38 : vector<8x128xf32>
    %46 = arith.mulf %40, %40 : vector<8x128xf32>
    %47 = arith.addf %45, %46 : vector<8x128xf32>
    %48 = arith.mulf %42, %42 : vector<8x128xf32>
    %49 = arith.addf %47, %48 : vector<8x128xf32>
    %50 = arith.mulf %44, %44 : vector<8x128xf32>
    %51 = arith.addf %49, %50 : vector<8x128xf32>
    %cst_45 = arith.constant 1.000000e-16 : f32
    %52 = vector.broadcast %cst_45 : f32 to vector<8x128xf32>
    %53 = arith.addf %51, %52 : vector<8x128xf32>
    %54 = math.rsqrt %53 : vector<8x128xf32>
    %55 = arith.mulf %38, %54 : vector<8x128xf32>
    %56 = arith.mulf %40, %54 : vector<8x128xf32>
    %57 = arith.mulf %42, %54 : vector<8x128xf32>
    %58 = arith.mulf %44, %54 : vector<8x128xf32>
    %59 = arith.mulf %18, %55 : vector<8x128xf32>
    %60 = arith.mulf %19, %56 : vector<8x128xf32>
    %61 = arith.subf %59, %60 : vector<8x128xf32>
    %62 = arith.mulf %20, %57 : vector<8x128xf32>
    %63 = arith.subf %61, %62 : vector<8x128xf32>
    %64 = arith.mulf %21, %58 : vector<8x128xf32>
    %65 = arith.subf %63, %64 : vector<8x128xf32>
    %66 = arith.mulf %18, %56 : vector<8x128xf32>
    %67 = arith.mulf %19, %55 : vector<8x128xf32>
    %68 = arith.addf %66, %67 : vector<8x128xf32>
    %69 = arith.mulf %20, %58 : vector<8x128xf32>
    %70 = arith.addf %68, %69 : vector<8x128xf32>
    %71 = arith.mulf %21, %57 : vector<8x128xf32>
    %72 = arith.subf %70, %71 : vector<8x128xf32>
    %73 = arith.mulf %18, %57 : vector<8x128xf32>
    %74 = arith.mulf %19, %58 : vector<8x128xf32>
    %75 = arith.subf %73, %74 : vector<8x128xf32>
    %76 = arith.mulf %20, %55 : vector<8x128xf32>
    %77 = arith.addf %75, %76 : vector<8x128xf32>
    %78 = arith.mulf %21, %56 : vector<8x128xf32>
    %79 = arith.addf %77, %78 : vector<8x128xf32>
    %80 = arith.mulf %18, %58 : vector<8x128xf32>
    %81 = arith.mulf %19, %57 : vector<8x128xf32>
    %82 = arith.addf %80, %81 : vector<8x128xf32>
    %83 = arith.mulf %20, %56 : vector<8x128xf32>
    %84 = arith.subf %82, %83 : vector<8x128xf32>
    %85 = arith.mulf %21, %55 : vector<8x128xf32>
    %86 = arith.addf %84, %85 : vector<8x128xf32>
    %cst_46 = arith.constant -2.000000e+00 : f32
    %87 = vector.broadcast %cst_46 : f32 to vector<8x128xf32>
    %88 = arith.mulf %87, %21 : vector<8x128xf32>
    %cst_47 = arith.constant 2.000000e+00 : f32
    %89 = vector.broadcast %cst_47 : f32 to vector<8x128xf32>
    %90 = arith.mulf %89, %19 : vector<8x128xf32>
    %91 = arith.mulf %18, %88 : vector<8x128xf32>
    %92 = arith.mulf %20, %90 : vector<8x128xf32>
    %93 = arith.addf %91, %92 : vector<8x128xf32>
    %94 = arith.mulf %21, %88 : vector<8x128xf32>
    %95 = arith.mulf %19, %90 : vector<8x128xf32>
    %96 = arith.subf %94, %95 : vector<8x128xf32>
    %97 = arith.mulf %18, %90 : vector<8x128xf32>
    %98 = arith.mulf %20, %88 : vector<8x128xf32>
    %cst_48 = arith.constant 0.000000e+00 : f32
    %99 = vector.broadcast %cst_48 : f32 to vector<8x128xf32>
    %100 = arith.subf %99, %98 : vector<8x128xf32>
    %101 = arith.addf %97, %100 : vector<8x128xf32>
    %c1_49 = arith.constant 1 : index
    %c0_50 = arith.constant 0 : index
    %c0_51 = arith.constant 0 : index
    %102 = vector.load %arg4[%c1_49, %c0_50, %c0_51] : memref<8x8x128xf32, #tpu.memory_space<vmem>>, vector<1x8x128xf32>
    %103 = vector.shape_cast %102 : vector<1x8x128xf32> to vector<8x128xf32>
    %104 = arith.mulf %93, %103 : vector<8x128xf32>
    %105 = arith.addf %23, %104 : vector<8x128xf32>
    %cst_52 = arith.constant 1.000000e+00 : f32
    %106 = vector.broadcast %cst_52 : f32 to vector<8x128xf32>
    %107 = arith.addf %106, %96 : vector<8x128xf32>
    %108 = arith.mulf %107, %103 : vector<8x128xf32>
    %109 = arith.addf %25, %108 : vector<8x128xf32>
    %110 = arith.mulf %101, %103 : vector<8x128xf32>
    %111 = arith.addf %27, %110 : vector<8x128xf32>
    %c1_53 = arith.constant 1 : index
    %c0_54 = arith.constant 0 : index
    %c0_55 = arith.constant 0 : index
    %c0_56 = arith.constant 0 : index
    %112 = vector.load %arg5[%c1_53, %c0_54, %c0_55, %c0_56] : memref<8x3x8x128xf32, #tpu.memory_space<vmem>>, vector<1x1x8x128xf32>
    %113 = vector.shape_cast %112 : vector<1x1x8x128xf32> to vector<8x128xf32>
    %114 = vector.shape_cast %105 : vector<8x128xf32> to vector<1x1x8x128xf32>
    tpu.vector_store %arg5[%c1_53, %c0_54, %c0_55, %c0_56], %114 {strides = array<i32>} : memref<8x3x8x128xf32, #tpu.memory_space<vmem>>, vector<1x1x8x128xf32>,
    %c1_57 = arith.constant 1 : index
    %c1_58 = arith.constant 1 : index
    %c0_59 = arith.constant 0 : index
    %c0_60 = arith.constant 0 : index
    %115 = vector.load %arg5[%c1_57, %c1_58, %c0_59, %c0_60] : memref<8x3x8x128xf32, #tpu.memory_space<vmem>>, vector<1x1x8x128xf32>
    %116 = vector.shape_cast %115 : vector<1x1x8x128xf32> to vector<8x128xf32>
    %117 = vector.shape_cast %109 : vector<8x128xf32> to vector<1x1x8x128xf32>
    tpu.vector_store %arg5[%c1_57, %c1_58, %c0_59, %c0_60], %117 {strides = array<i32>} : memref<8x3x8x128xf32, #tpu.memory_space<vmem>>, vector<1x1x8x128xf32>,
    %c1_61 = arith.constant 1 : index
    %c2_62 = arith.constant 2 : index
    %c0_63 = arith.constant 0 : index
    %c0_64 = arith.constant 0 : index
    %118 = vector.load %arg5[%c1_61, %c2_62, %c0_63, %c0_64] : memref<8x3x8x128xf32, #tpu.memory_space<vmem>>, vector<1x1x8x128xf32>
    %119 = vector.shape_cast %118 : vector<1x1x8x128xf32> to vector<8x128xf32>
    %120 = vector.shape_cast %111 : vector<8x128xf32> to vector<1x1x8x128xf32>
    tpu.vector_store %arg5[%c1_61, %c2_62, %c0_63, %c0_64], %120 {strides = array<i32>} : memref<8x3x8x128xf32, #tpu.memory_space<vmem>>, vector<1x1x8x128xf32>,
    %c1_65 = arith.constant 1 : index
    %c0_66 = arith.constant 0 : index
    %c0_67 = arith.constant 0 : index
    %c0_68 = arith.constant 0 : index
    %121 = vector.load %arg3[%c1_65, %c0_66, %c0_67, %c0_68] : memref<4x4x8x128xf32, #tpu.memory_space<vmem>>, vector<1x1x8x128xf32>
    %122 = vector.shape_cast %121 : vector<1x1x8x128xf32> to vector<8x128xf32>
    %c1_69 = arith.constant 1 : index
    %c1_70 = arith.constant 1 : index
    %c0_71 = arith.constant 0 : index
    %c0_72 = arith.constant 0 : index
    %123 = vector.load %arg3[%c1_69, %c1_70, %c0_71, %c0_72] : memref<4x4x8x128xf32, #tpu.memory_space<vmem>>, vector<1x1x8x128xf32>
    %124 = vector.shape_cast %123 : vector<1x1x8x128xf32> to vector<8x128xf32>
    %c1_73 = arith.constant 1 : index
    %c2_74 = arith.constant 2 : index
    %c0_75 = arith.constant 0 : index
    %c0_76 = arith.constant 0 : index
    %125 = vector.load %arg3[%c1_73, %c2_74, %c0_75, %c0_76] : memref<4x4x8x128xf32, #tpu.memory_space<vmem>>, vector<1x1x8x128xf32>
    %126 = vector.shape_cast %125 : vector<1x1x8x128xf32> to vector<8x128xf32>
    %c1_77 = arith.constant 1 : index
    %c3_78 = arith.constant 3 : index
    %c0_79 = arith.constant 0 : index
    %c0_80 = arith.constant 0 : index
    %127 = vector.load %arg3[%c1_77, %c3_78, %c0_79, %c0_80] : memref<4x4x8x128xf32, #tpu.memory_space<vmem>>, vector<1x1x8x128xf32>
    %128 = vector.shape_cast %127 : vector<1x1x8x128xf32> to vector<8x128xf32>
    %129 = arith.mulf %122, %122 : vector<8x128xf32>
    %130 = arith.mulf %124, %124 : vector<8x128xf32>
    %131 = arith.addf %129, %130 : vector<8x128xf32>
    %132 = arith.mulf %126, %126 : vector<8x128xf32>
    %133 = arith.addf %131, %132 : vector<8x128xf32>
    %134 = arith.mulf %128, %128 : vector<8x128xf32>
    %135 = arith.addf %133, %134 : vector<8x128xf32>
    %cst_81 = arith.constant 1.000000e-16 : f32
    %136 = vector.broadcast %cst_81 : f32 to vector<8x128xf32>
    %137 = arith.addf %135, %136 : vector<8x128xf32>
    %138 = math.rsqrt %137 : vector<8x128xf32>
    %139 = arith.mulf %122, %138 : vector<8x128xf32>
    %140 = arith.mulf %124, %138 : vector<8x128xf32>
    %141 = arith.mulf %126, %138 : vector<8x128xf32>
    %142 = arith.mulf %128, %138 : vector<8x128xf32>
    %143 = arith.mulf %18, %139 : vector<8x128xf32>
    %144 = arith.mulf %19, %140 : vector<8x128xf32>
    %145 = arith.subf %143, %144 : vector<8x128xf32>
    %146 = arith.mulf %20, %141 : vector<8x128xf32>
    %147 = arith.subf %145, %146 : vector<8x128xf32>
    %148 = arith.mulf %21, %142 : vector<8x128xf32>
    %149 = arith.subf %147, %148 : vector<8x128xf32>
    %150 = arith.mulf %18, %140 : vector<8x128xf32>
    %151 = arith.mulf %19, %139 : vector<8x128xf32>
    %152 = arith.addf %150, %151 : vector<8x128xf32>
    %153 = arith.mulf %20, %142 : vector<8x128xf32>
    %154 = arith.addf %152, %153 : vector<8x128xf32>
    %155 = arith.mulf %21, %141 : vector<8x128xf32>
    %156 = arith.subf %154, %155 : vector<8x128xf32>
    %157 = arith.mulf %18, %141 : vector<8x128xf32>
    %158 = arith.mulf %19, %142 : vector<8x128xf32>
    %159 = arith.subf %157, %158 : vector<8x128xf32>
    %160 = arith.mulf %20, %139 : vector<8x128xf32>
    %161 = arith.addf %159, %160 : vector<8x128xf32>
    %162 = arith.mulf %21, %140 : vector<8x128xf32>
    %163 = arith.addf %161, %162 : vector<8x128xf32>
    %164 = arith.mulf %18, %142 : vector<8x128xf32>
    %165 = arith.mulf %19, %141 : vector<8x128xf32>
    %166 = arith.addf %164, %165 : vector<8x128xf32>
    %167 = arith.mulf %20, %140 : vector<8x128xf32>
    %168 = arith.subf %166, %167 : vector<8x128xf32>
    %169 = arith.mulf %21, %139 : vector<8x128xf32>
    %170 = arith.addf %168, %169 : vector<8x128xf32>
    %cst_82 = arith.constant -0.199007437 : f32
    %171 = vector.broadcast %cst_82 : f32 to vector<8x128xf32>
    %172 = arith.mulf %171, %21 : vector<8x128xf32>
    %cst_83 = arith.constant 1.99007428 : f32
    %173 = vector.broadcast %cst_83 : f32 to vector<8x128xf32>
    %174 = arith.mulf %173, %21 : vector<8x128xf32>
    %cst_84 = arith.constant 0.199007437 : f32
    %175 = vector.broadcast %cst_84 : f32 to vector<8x128xf32>
    %176 = arith.mulf %175, %19 : vector<8x128xf32>
    %cst_85 = arith.constant -1.99007428 : f32
    %177 = vector.broadcast %cst_85 : f32 to vector<8x128xf32>
    %178 = arith.mulf %177, %20 : vector<8x128xf32>
    %179 = arith.addf %176, %178 : vector<8x128xf32>
    %180 = arith.mulf %18, %172 : vector<8x128xf32>
    %181 = arith.mulf %20, %179 : vector<8x128xf32>
    %182 = arith.mulf %21, %174 : vector<8x128xf32>
    %183 = arith.subf %181, %182 : vector<8x128xf32>
    %184 = arith.addf %180, %183 : vector<8x128xf32>
    %185 = arith.mulf %18, %174 : vector<8x128xf32>
    %186 = arith.mulf %21, %172 : vector<8x128xf32>
    %187 = arith.mulf %19, %179 : vector<8x128xf32>
    %188 = arith.subf %186, %187 : vector<8x128xf32>
    %189 = arith.addf %185, %188 : vector<8x128xf32>
    %190 = arith.mulf %18, %179 : vector<8x128xf32>
    %191 = arith.mulf %19, %174 : vector<8x128xf32>
    %192 = arith.mulf %20, %172 : vector<8x128xf32>
    %193 = arith.subf %191, %192 : vector<8x128xf32>
    %194 = arith.addf %190, %193 : vector<8x128xf32>
    %c4 = arith.constant 4 : index
    %c0_86 = arith.constant 0 : index
    %c0_87 = arith.constant 0 : index
    %195 = vector.load %arg4[%c4, %c0_86, %c0_87] : memref<8x8x128xf32, #tpu.memory_space<vmem>>, vector<1x8x128xf32>
    %196 = vector.shape_cast %195 : vector<1x8x128xf32> to vector<8x128xf32>
    %cst_88 = arith.constant 0.995037138 : f32
    %197 = vector.broadcast %cst_88 : f32 to vector<8x128xf32>
    %198 = arith.addf %197, %184 : vector<8x128xf32>
    %199 = arith.mulf %198, %196 : vector<8x128xf32>
    %200 = arith.addf %23, %199 : vector<8x128xf32>
    %cst_89 = arith.constant 0.0995037183 : f32
    %201 = vector.broadcast %cst_89 : f32 to vector<8x128xf32>
    %202 = arith.addf %201, %189 : vector<8x128xf32>
    %203 = arith.mulf %202, %196 : vector<8x128xf32>
    %204 = arith.addf %25, %203 : vector<8x128xf32>
    %205 = arith.mulf %194, %196 : vector<8x128xf32>
    %206 = arith.addf %27, %205 : vector<8x128xf32>
    %c4_90 = arith.constant 4 : index
    %c0_91 = arith.constant 0 : index
    %c0_92 = arith.constant 0 : index
    %c0_93 = arith.constant 0 : index
    %207 = vector.load %arg5[%c4_90, %c0_91, %c0_92, %c0_93] : memref<8x3x8x128xf32, #tpu.memory_space<vmem>>, vector<1x1x8x128xf32>
    %208 = vector.shape_cast %207 : vector<1x1x8x128xf32> to vector<8x128xf32>
    %209 = vector.shape_cast %200 : vector<8x128xf32> to vector<1x1x8x128xf32>
    tpu.vector_store %arg5[%c4_90, %c0_91, %c0_92, %c0_93], %209 {strides = array<i32>} : memref<8x3x8x128xf32, #tpu.memory_space<vmem>>, vector<1x1x8x128xf32>,
    %c4_94 = arith.constant 4 : index
    %c1_95 = arith.constant 1 : index
    %c0_96 = arith.constant 0 : index
    %c0_97 = arith.constant 0 : index
    %210 = vector.load %arg5[%c4_94, %c1_95, %c0_96, %c0_97] : memref<8x3x8x128xf32, #tpu.memory_space<vmem>>, vector<1x1x8x128xf32>
    %211 = vector.shape_cast %210 : vector<1x1x8x128xf32> to vector<8x128xf32>
    %212 = vector.shape_cast %204 : vector<8x128xf32> to vector<1x1x8x128xf32>
    tpu.vector_store %arg5[%c4_94, %c1_95, %c0_96, %c0_97], %212 {strides = array<i32>} : memref<8x3x8x128xf32, #tpu.memory_space<vmem>>, vector<1x1x8x128xf32>,
    %c4_98 = arith.constant 4 : index
    %c2_99 = arith.constant 2 : index
    %c0_100 = arith.constant 0 : index
    %c0_101 = arith.constant 0 : index
    %213 = vector.load %arg5[%c4_98, %c2_99, %c0_100, %c0_101] : memref<8x3x8x128xf32, #tpu.memory_space<vmem>>, vector<1x1x8x128xf32>
    %214 = vector.shape_cast %213 : vector<1x1x8x128xf32> to vector<8x128xf32>
    %215 = vector.shape_cast %206 : vector<8x128xf32> to vector<1x1x8x128xf32>
    tpu.vector_store %arg5[%c4_98, %c2_99, %c0_100, %c0_101], %215 {strides = array<i32>} : memref<8x3x8x128xf32, #tpu.memory_space<vmem>>, vector<1x1x8x128xf32>,
    %c2_102 = arith.constant 2 : index
    %c0_103 = arith.constant 0 : index
    %c0_104 = arith.constant 0 : index
    %c0_105 = arith.constant 0 : index
    %216 = vector.load %arg3[%c2_102, %c0_103, %c0_104, %c0_105] : memref<4x4x8x128xf32, #tpu.memory_space<vmem>>, vector<1x1x8x128xf32>
    %217 = vector.shape_cast %216 : vector<1x1x8x128xf32> to vector<8x128xf32>
    %c2_106 = arith.constant 2 : index
    %c1_107 = arith.constant 1 : index
    %c0_108 = arith.constant 0 : index
    %c0_109 = arith.constant 0 : index
    %218 = vector.load %arg3[%c2_106, %c1_107, %c0_108, %c0_109] : memref<4x4x8x128xf32, #tpu.memory_space<vmem>>, vector<1x1x8x128xf32>
    %219 = vector.shape_cast %218 : vector<1x1x8x128xf32> to vector<8x128xf32>
    %c2_110 = arith.constant 2 : index
    %c2_111 = arith.constant 2 : index
    %c0_112 = arith.constant 0 : index
    %c0_113 = arith.constant 0 : index
    %220 = vector.load %arg3[%c2_110, %c2_111, %c0_112, %c0_113] : memref<4x4x8x128xf32, #tpu.memory_space<vmem>>, vector<1x1x8x128xf32>
    %221 = vector.shape_cast %220 : vector<1x1x8x128xf32> to vector<8x128xf32>
    %c2_114 = arith.constant 2 : index
    %c3_115 = arith.constant 3 : index
    %c0_116 = arith.constant 0 : index
    %c0_117 = arith.constant 0 : index
    %222 = vector.load %arg3[%c2_114, %c3_115, %c0_116, %c0_117] : memref<4x4x8x128xf32, #tpu.memory_space<vmem>>, vector<1x1x8x128xf32>
    %223 = vector.shape_cast %222 : vector<1x1x8x128xf32> to vector<8x128xf32>
    %224 = arith.mulf %217, %217 : vector<8x128xf32>
    %225 = arith.mulf %219, %219 : vector<8x128xf32>
    %226 = arith.addf %224, %225 : vector<8x128xf32>
    %227 = arith.mulf %221, %221 : vector<8x128xf32>
    %228 = arith.addf %226, %227 : vector<8x128xf32>
    %229 = arith.mulf %223, %223 : vector<8x128xf32>
    %230 = arith.addf %228, %229 : vector<8x128xf32>
    %cst_118 = arith.constant 1.000000e-16 : f32
    %231 = vector.broadcast %cst_118 : f32 to vector<8x128xf32>
    %232 = arith.addf %230, %231 : vector<8x128xf32>
    %233 = math.rsqrt %232 : vector<8x128xf32>
    %234 = arith.mulf %217, %233 : vector<8x128xf32>
    %235 = arith.mulf %219, %233 : vector<8x128xf32>
    %236 = arith.mulf %221, %233 : vector<8x128xf32>
    %237 = arith.mulf %223, %233 : vector<8x128xf32>
    %238 = arith.mulf %18, %234 : vector<8x128xf32>
    %239 = arith.mulf %19, %235 : vector<8x128xf32>
    %240 = arith.subf %238, %239 : vector<8x128xf32>
    %241 = arith.mulf %20, %236 : vector<8x128xf32>
    %242 = arith.subf %240, %241 : vector<8x128xf32>
    %243 = arith.mulf %21, %237 : vector<8x128xf32>
    %244 = arith.subf %242, %243 : vector<8x128xf32>
    %245 = arith.mulf %18, %235 : vector<8x128xf32>
    %246 = arith.mulf %19, %234 : vector<8x128xf32>
    %247 = arith.addf %245, %246 : vector<8x128xf32>
    %248 = arith.mulf %20, %237 : vector<8x128xf32>
    %249 = arith.addf %247, %248 : vector<8x128xf32>
    %250 = arith.mulf %21, %236 : vector<8x128xf32>
    %251 = arith.subf %249, %250 : vector<8x128xf32>
    %252 = arith.mulf %18, %236 : vector<8x128xf32>
    %253 = arith.mulf %19, %237 : vector<8x128xf32>
    %254 = arith.subf %252, %253 : vector<8x128xf32>
    %255 = arith.mulf %20, %234 : vector<8x128xf32>
    %256 = arith.addf %254, %255 : vector<8x128xf32>
    %257 = arith.mulf %21, %235 : vector<8x128xf32>
    %258 = arith.addf %256, %257 : vector<8x128xf32>
    %259 = arith.mulf %18, %237 : vector<8x128xf32>
    %260 = arith.mulf %19, %236 : vector<8x128xf32>
    %261 = arith.addf %259, %260 : vector<8x128xf32>
    %262 = arith.mulf %20, %235 : vector<8x128xf32>
    %263 = arith.subf %261, %262 : vector<8x128xf32>
    %264 = arith.mulf %21, %234 : vector<8x128xf32>
    %265 = arith.addf %263, %264 : vector<8x128xf32>
    %cst_119 = arith.constant -0.199007437 : f32
    %266 = vector.broadcast %cst_119 : f32 to vector<8x128xf32>
    %267 = arith.mulf %266, %21 : vector<8x128xf32>
    %cst_120 = arith.constant -1.99007428 : f32
    %268 = vector.broadcast %cst_120 : f32 to vector<8x128xf32>
    %269 = arith.mulf %268, %21 : vector<8x128xf32>
    %cst_121 = arith.constant 0.199007437 : f32
    %270 = vector.broadcast %cst_121 : f32 to vector<8x128xf32>
    %271 = arith.mulf %270, %19 : vector<8x128xf32>
    %cst_122 = arith.constant 1.99007428 : f32
    %272 = vector.broadcast %cst_122 : f32 to vector<8x128xf32>
    %273 = arith.mulf %272, %20 : vector<8x128xf32>
    %274 = arith.addf %271, %273 : vector<8x128xf32>
    %275 = arith.mulf %18, %267 : vector<8x128xf32>
    %276 = arith.mulf %20, %274 : vector<8x128xf32>
    %277 = arith.mulf %21, %269 : vector<8x128xf32>
    %278 = arith.subf %276, %277 : vector<8x128xf32>
    %279 = arith.addf %275, %278 : vector<8x128xf32>
    %280 = arith.mulf %18, %269 : vector<8x128xf32>
    %281 = arith.mulf %21, %267 : vector<8x128xf32>
    %282 = arith.mulf %19, %274 : vector<8x128xf32>
    %283 = arith.subf %281, %282 : vector<8x128xf32>
    %284 = arith.addf %280, %283 : vector<8x128xf32>
    %285 = arith.mulf %18, %274 : vector<8x128xf32>
    %286 = arith.mulf %19, %269 : vector<8x128xf32>
    %287 = arith.mulf %20, %267 : vector<8x128xf32>
    %288 = arith.subf %286, %287 : vector<8x128xf32>
    %289 = arith.addf %285, %288 : vector<8x128xf32>
    %c6 = arith.constant 6 : index
    %c0_123 = arith.constant 0 : index
    %c0_124 = arith.constant 0 : index
    %290 = vector.load %arg4[%c6, %c0_123, %c0_124] : memref<8x8x128xf32, #tpu.memory_space<vmem>>, vector<1x8x128xf32>
    %291 = vector.shape_cast %290 : vector<1x8x128xf32> to vector<8x128xf32>
    %cst_125 = arith.constant -0.995037138 : f32
    %292 = vector.broadcast %cst_125 : f32 to vector<8x128xf32>
    %293 = arith.addf %292, %279 : vector<8x128xf32>
    %294 = arith.mulf %293, %291 : vector<8x128xf32>
    %295 = arith.addf %23, %294 : vector<8x128xf32>
    %cst_126 = arith.constant 0.0995037183 : f32
    %296 = vector.broadcast %cst_126 : f32 to vector<8x128xf32>
    %297 = arith.addf %296, %284 : vector<8x128xf32>
    %298 = arith.mulf %297, %291 : vector<8x128xf32>
    %299 = arith.addf %25, %298 : vector<8x128xf32>
    %300 = arith.mulf %289, %291 : vector<8x128xf32>
    %301 = arith.addf %27, %300 : vector<8x128xf32>
    %c6_127 = arith.constant 6 : index
    %c0_128 = arith.constant 0 : index
    %c0_129 = arith.constant 0 : index
    %c0_130 = arith.constant 0 : index
    %302 = vector.load %arg5[%c6_127, %c0_128, %c0_129, %c0_130] : memref<8x3x8x128xf32, #tpu.memory_space<vmem>>, vector<1x1x8x128xf32>
    %303 = vector.shape_cast %302 : vector<1x1x8x128xf32> to vector<8x128xf32>
    %304 = vector.shape_cast %295 : vector<8x128xf32> to vector<1x1x8x128xf32>
    tpu.vector_store %arg5[%c6_127, %c0_128, %c0_129, %c0_130], %304 {strides = array<i32>} : memref<8x3x8x128xf32, #tpu.memory_space<vmem>>, vector<1x1x8x128xf32>,
    %c6_131 = arith.constant 6 : index
    %c1_132 = arith.constant 1 : index
    %c0_133 = arith.constant 0 : index
    %c0_134 = arith.constant 0 : index
    %305 = vector.load %arg5[%c6_131, %c1_132, %c0_133, %c0_134] : memref<8x3x8x128xf32, #tpu.memory_space<vmem>>, vector<1x1x8x128xf32>
    %306 = vector.shape_cast %305 : vector<1x1x8x128xf32> to vector<8x128xf32>
    %307 = vector.shape_cast %299 : vector<8x128xf32> to vector<1x1x8x128xf32>
    tpu.vector_store %arg5[%c6_131, %c1_132, %c0_133, %c0_134], %307 {strides = array<i32>} : memref<8x3x8x128xf32, #tpu.memory_space<vmem>>, vector<1x1x8x128xf32>,
    %c6_135 = arith.constant 6 : index
    %c2_136 = arith.constant 2 : index
    %c0_137 = arith.constant 0 : index
    %c0_138 = arith.constant 0 : index
    %308 = vector.load %arg5[%c6_135, %c2_136, %c0_137, %c0_138] : memref<8x3x8x128xf32, #tpu.memory_space<vmem>>, vector<1x1x8x128xf32>
    %309 = vector.shape_cast %308 : vector<1x1x8x128xf32> to vector<8x128xf32>
    %310 = vector.shape_cast %301 : vector<8x128xf32> to vector<1x1x8x128xf32>
    tpu.vector_store %arg5[%c6_135, %c2_136, %c0_137, %c0_138], %310 {strides = array<i32>} : memref<8x3x8x128xf32, #tpu.memory_space<vmem>>, vector<1x1x8x128xf32>,
    %c3_139 = arith.constant 3 : index
    %c0_140 = arith.constant 0 : index
    %c0_141 = arith.constant 0 : index
    %c0_142 = arith.constant 0 : index
    %311 = vector.load %arg3[%c3_139, %c0_140, %c0_141, %c0_142] : memref<4x4x8x128xf32, #tpu.memory_space<vmem>>, vector<1x1x8x128xf32>
    %312 = vector.shape_cast %311 : vector<1x1x8x128xf32> to vector<8x128xf32>
    %c3_143 = arith.constant 3 : index
    %c1_144 = arith.constant 1 : index
    %c0_145 = arith.constant 0 : index
    %c0_146 = arith.constant 0 : index
    %313 = vector.load %arg3[%c3_143, %c1_144, %c0_145, %c0_146] : memref<4x4x8x128xf32, #tpu.memory_space<vmem>>, vector<1x1x8x128xf32>
    %314 = vector.shape_cast %313 : vector<1x1x8x128xf32> to vector<8x128xf32>
    %c3_147 = arith.constant 3 : index
    %c2_148 = arith.constant 2 : index
    %c0_149 = arith.constant 0 : index
    %c0_150 = arith.constant 0 : index
    %315 = vector.load %arg3[%c3_147, %c2_148, %c0_149, %c0_150] : memref<4x4x8x128xf32, #tpu.memory_space<vmem>>, vector<1x1x8x128xf32>
    %316 = vector.shape_cast %315 : vector<1x1x8x128xf32> to vector<8x128xf32>
    %c3_151 = arith.constant 3 : index
    %c3_152 = arith.constant 3 : index
    %c0_153 = arith.constant 0 : index
    %c0_154 = arith.constant 0 : index
    %317 = vector.load %arg3[%c3_151, %c3_152, %c0_153, %c0_154] : memref<4x4x8x128xf32, #tpu.memory_space<vmem>>, vector<1x1x8x128xf32>
    %318 = vector.shape_cast %317 : vector<1x1x8x128xf32> to vector<8x128xf32>
    %319 = arith.mulf %312, %312 : vector<8x128xf32>
    %320 = arith.mulf %314, %314 : vector<8x128xf32>
    %321 = arith.addf %319, %320 : vector<8x128xf32>
    %322 = arith.mulf %316, %316 : vector<8x128xf32>
    %323 = arith.addf %321, %322 : vector<8x128xf32>
    %324 = arith.mulf %318, %318 : vector<8x128xf32>
    %325 = arith.addf %323, %324 : vector<8x128xf32>
    %cst_155 = arith.constant 1.000000e-16 : f32
    %326 = vector.broadcast %cst_155 : f32 to vector<8x128xf32>
    %327 = arith.addf %325, %326 : vector<8x128xf32>
    %328 = math.rsqrt %327 : vector<8x128xf32>
    %329 = arith.mulf %312, %328 : vector<8x128xf32>
    %330 = arith.mulf %314, %328 : vector<8x128xf32>
    %331 = arith.mulf %316, %328 : vector<8x128xf32>
    %332 = arith.mulf %318, %328 : vector<8x128xf32>
    %333 = arith.mulf %65, %329 : vector<8x128xf32>
    %334 = arith.mulf %72, %330 : vector<8x128xf32>
    %335 = arith.subf %333, %334 : vector<8x128xf32>
    %336 = arith.mulf %79, %331 : vector<8x128xf32>
    %337 = arith.subf %335, %336 : vector<8x128xf32>
    %338 = arith.mulf %86, %332 : vector<8x128xf32>
    %339 = arith.subf %337, %338 : vector<8x128xf32>
    %340 = arith.mulf %65, %330 : vector<8x128xf32>
    %341 = arith.mulf %72, %329 : vector<8x128xf32>
    %342 = arith.addf %340, %341 : vector<8x128xf32>
    %343 = arith.mulf %79, %332 : vector<8x128xf32>
    %344 = arith.addf %342, %343 : vector<8x128xf32>
    %345 = arith.mulf %86, %331 : vector<8x128xf32>
    %346 = arith.subf %344, %345 : vector<8x128xf32>
    %347 = arith.mulf %65, %331 : vector<8x128xf32>
    %348 = arith.mulf %72, %332 : vector<8x128xf32>
    %349 = arith.subf %347, %348 : vector<8x128xf32>
    %350 = arith.mulf %79, %329 : vector<8x128xf32>
    %351 = arith.addf %349, %350 : vector<8x128xf32>
    %352 = arith.mulf %86, %330 : vector<8x128xf32>
    %353 = arith.addf %351, %352 : vector<8x128xf32>
    %354 = arith.mulf %65, %332 : vector<8x128xf32>
    %355 = arith.mulf %72, %331 : vector<8x128xf32>
    %356 = arith.addf %354, %355 : vector<8x128xf32>
    %357 = arith.mulf %79, %330 : vector<8x128xf32>
    %358 = arith.subf %356, %357 : vector<8x128xf32>
    %359 = arith.mulf %86, %329 : vector<8x128xf32>
    %360 = arith.addf %358, %359 : vector<8x128xf32>
    %cst_156 = arith.constant 0.215665549 : f32
    %361 = vector.broadcast %cst_156 : f32 to vector<8x128xf32>
    %362 = arith.mulf %361, %79 : vector<8x128xf32>
    %cst_157 = arith.constant -1.94098985 : f32
    %363 = vector.broadcast %cst_157 : f32 to vector<8x128xf32>
    %364 = arith.mulf %363, %86 : vector<8x128xf32>
    %365 = arith.addf %362, %364 : vector<8x128xf32>
    %cst_158 = arith.constant 0.431331098 : f32
    %366 = vector.broadcast %cst_158 : f32 to vector<8x128xf32>
    %367 = arith.mulf %366, %86 : vector<8x128xf32>
    %cst_159 = arith.constant -0.215665549 : f32
    %368 = vector.broadcast %cst_159 : f32 to vector<8x128xf32>
    %369 = arith.mulf %368, %72 : vector<8x128xf32>
    %370 = arith.addf %367, %369 : vector<8x128xf32>
    %cst_160 = arith.constant 1.94098985 : f32
    %371 = vector.broadcast %cst_160 : f32 to vector<8x128xf32>
    %372 = arith.mulf %371, %72 : vector<8x128xf32>
    %cst_161 = arith.constant -0.431331098 : f32
    %373 = vector.broadcast %cst_161 : f32 to vector<8x128xf32>
    %374 = arith.mulf %373, %79 : vector<8x128xf32>
    %375 = arith.addf %372, %374 : vector<8x128xf32>
    %376 = arith.mulf %65, %365 : vector<8x128xf32>
    %377 = arith.mulf %79, %375 : vector<8x128xf32>
    %378 = arith.mulf %86, %370 : vector<8x128xf32>
    %379 = arith.subf %377, %378 : vector<8x128xf32>
    %380 = arith.addf %376, %379 : vector<8x128xf32>
    %381 = arith.mulf %65, %370 : vector<8x128xf32>
    %382 = arith.mulf %86, %365 : vector<8x128xf32>
    %383 = arith.mulf %72, %375 : vector<8x128xf32>
    %384 = arith.subf %382, %383 : vector<8x128xf32>
    %385 = arith.addf %381, %384 : vector<8x128xf32>
    %386 = arith.mulf %65, %375 : vector<8x128xf32>
    %387 = arith.mulf %72, %370 : vector<8x128xf32>
    %388 = arith.mulf %79, %365 : vector<8x128xf32>
    %389 = arith.subf %387, %388 : vector<8x128xf32>
    %390 = arith.addf %386, %389 : vector<8x128xf32>
    %c2_162 = arith.constant 2 : index
    %c0_163 = arith.constant 0 : index
    %c0_164 = arith.constant 0 : index
    %391 = vector.load %arg4[%c2_162, %c0_163, %c0_164] : memref<8x8x128xf32, #tpu.memory_space<vmem>>, vector<1x8x128xf32>
    %392 = vector.shape_cast %391 : vector<1x8x128xf32> to vector<8x128xf32>
    %cst_165 = arith.constant 0.215665549 : f32
    %393 = vector.broadcast %cst_165 : f32 to vector<8x128xf32>
    %394 = arith.addf %393, %380 : vector<8x128xf32>
    %395 = arith.mulf %394, %392 : vector<8x128xf32>
    %396 = arith.addf %105, %395 : vector<8x128xf32>
    %cst_166 = arith.constant 0.970494925 : f32
    %397 = vector.broadcast %cst_166 : f32 to vector<8x128xf32>
    %398 = arith.addf %397, %385 : vector<8x128xf32>
    %399 = arith.mulf %398, %392 : vector<8x128xf32>
    %400 = arith.addf %109, %399 : vector<8x128xf32>
    %cst_167 = arith.constant 0.107832775 : f32
    %401 = vector.broadcast %cst_167 : f32 to vector<8x128xf32>
    %402 = arith.addf %401, %390 : vector<8x128xf32>
    %403 = arith.mulf %402, %392 : vector<8x128xf32>
    %404 = arith.addf %111, %403 : vector<8x128xf32>
    %c2_168 = arith.constant 2 : index
    %c0_169 = arith.constant 0 : index
    %c0_170 = arith.constant 0 : index
    %c0_171 = arith.constant 0 : index
    %405 = vector.load %arg5[%c2_168, %c0_169, %c0_170, %c0_171] : memref<8x3x8x128xf32, #tpu.memory_space<vmem>>, vector<1x1x8x128xf32>
    %406 = vector.shape_cast %405 : vector<1x1x8x128xf32> to vector<8x128xf32>
    %407 = vector.shape_cast %396 : vector<8x128xf32> to vector<1x1x8x128xf32>
    tpu.vector_store %arg5[%c2_168, %c0_169, %c0_170, %c0_171], %407 {strides = array<i32>} : memref<8x3x8x128xf32, #tpu.memory_space<vmem>>, vector<1x1x8x128xf32>,
    %c2_172 = arith.constant 2 : index
    %c1_173 = arith.constant 1 : index
    %c0_174 = arith.constant 0 : index
    %c0_175 = arith.constant 0 : index
    %408 = vector.load %arg5[%c2_172, %c1_173, %c0_174, %c0_175] : memref<8x3x8x128xf32, #tpu.memory_space<vmem>>, vector<1x1x8x128xf32>
    %409 = vector.shape_cast %408 : vector<1x1x8x128xf32> to vector<8x128xf32>
    %410 = vector.shape_cast %400 : vector<8x128xf32> to vector<1x1x8x128xf32>
    tpu.vector_store %arg5[%c2_172, %c1_173, %c0_174, %c0_175], %410 {strides = array<i32>} : memref<8x3x8x128xf32, #tpu.memory_space<vmem>>, vector<1x1x8x128xf32>,
    %c2_176 = arith.constant 2 : index
    %c2_177 = arith.constant 2 : index
    %c0_178 = arith.constant 0 : index
    %c0_179 = arith.constant 0 : index
    %411 = vector.load %arg5[%c2_176, %c2_177, %c0_178, %c0_179] : memref<8x3x8x128xf32, #tpu.memory_space<vmem>>, vector<1x1x8x128xf32>
    %412 = vector.shape_cast %411 : vector<1x1x8x128xf32> to vector<8x128xf32>
    %413 = vector.shape_cast %404 : vector<8x128xf32> to vector<1x1x8x128xf32>
    tpu.vector_store %arg5[%c2_176, %c2_177, %c0_178, %c0_179], %413 {strides = array<i32>} : memref<8x3x8x128xf32, #tpu.memory_space<vmem>>, vector<1x1x8x128xf32>,
    %cst_180 = arith.constant 0.215665549 : f32
    %414 = vector.broadcast %cst_180 : f32 to vector<8x128xf32>
    %415 = arith.mulf %414, %163 : vector<8x128xf32>
    %cst_181 = arith.constant 0.431331098 : f32
    %416 = vector.broadcast %cst_181 : f32 to vector<8x128xf32>
    %417 = arith.mulf %416, %170 : vector<8x128xf32>
    %418 = arith.addf %415, %417 : vector<8x128xf32>
    %cst_182 = arith.constant 1.94098985 : f32
    %419 = vector.broadcast %cst_182 : f32 to vector<8x128xf32>
    %420 = arith.mulf %419, %170 : vector<8x128xf32>
    %cst_183 = arith.constant -0.215665549 : f32
    %421 = vector.broadcast %cst_183 : f32 to vector<8x128xf32>
    %422 = arith.mulf %421, %156 : vector<8x128xf32>
    %423 = arith.addf %420, %422 : vector<8x128xf32>
    %cst_184 = arith.constant -0.431331098 : f32
    %424 = vector.broadcast %cst_184 : f32 to vector<8x128xf32>
    %425 = arith.mulf %424, %156 : vector<8x128xf32>
    %cst_185 = arith.constant -1.94098985 : f32
    %426 = vector.broadcast %cst_185 : f32 to vector<8x128xf32>
    %427 = arith.mulf %426, %163 : vector<8x128xf32>
    %428 = arith.addf %425, %427 : vector<8x128xf32>
    %429 = arith.mulf %149, %418 : vector<8x128xf32>
    %430 = arith.mulf %163, %428 : vector<8x128xf32>
    %431 = arith.mulf %170, %423 : vector<8x128xf32>
    %432 = arith.subf %430, %431 : vector<8x128xf32>
    %433 = arith.addf %429, %432 : vector<8x128xf32>
    %434 = arith.mulf %149, %423 : vector<8x128xf32>
    %435 = arith.mulf %170, %418 : vector<8x128xf32>
    %436 = arith.mulf %156, %428 : vector<8x128xf32>
    %437 = arith.subf %435, %436 : vector<8x128xf32>
    %438 = arith.addf %434, %437 : vector<8x128xf32>
    %439 = arith.mulf %149, %428 : vector<8x128xf32>
    %440 = arith.mulf %156, %423 : vector<8x128xf32>
    %441 = arith.mulf %163, %418 : vector<8x128xf32>
    %442 = arith.subf %440, %441 : vector<8x128xf32>
    %443 = arith.addf %439, %442 : vector<8x128xf32>
    %c5 = arith.constant 5 : index
    %c0_186 = arith.constant 0 : index
    %c0_187 = arith.constant 0 : index
    %444 = vector.load %arg4[%c5, %c0_186, %c0_187] : memref<8x8x128xf32, #tpu.memory_space<vmem>>, vector<1x8x128xf32>
    %445 = vector.shape_cast %444 : vector<1x8x128xf32> to vector<8x128xf32>
    %cst_188 = arith.constant 0.970494925 : f32
    %446 = vector.broadcast %cst_188 : f32 to vector<8x128xf32>
    %447 = arith.addf %446, %433 : vector<8x128xf32>
    %448 = arith.mulf %447, %445 : vector<8x128xf32>
    %449 = arith.addf %200, %448 : vector<8x128xf32>
    %cst_189 = arith.constant -0.215665549 : f32
    %450 = vector.broadcast %cst_189 : f32 to vector<8x128xf32>
    %451 = arith.addf %450, %438 : vector<8x128xf32>
    %452 = arith.mulf %451, %445 : vector<8x128xf32>
    %453 = arith.addf %204, %452 : vector<8x128xf32>
    %cst_190 = arith.constant 0.107832775 : f32
    %454 = vector.broadcast %cst_190 : f32 to vector<8x128xf32>
    %455 = arith.addf %454, %443 : vector<8x128xf32>
    %456 = arith.mulf %455, %445 : vector<8x128xf32>
    %457 = arith.addf %206, %456 : vector<8x128xf32>
    %c5_191 = arith.constant 5 : index
    %c0_192 = arith.constant 0 : index
    %c0_193 = arith.constant 0 : index
    %c0_194 = arith.constant 0 : index
    %458 = vector.load %arg5[%c5_191, %c0_192, %c0_193, %c0_194] : memref<8x3x8x128xf32, #tpu.memory_space<vmem>>, vector<1x1x8x128xf32>
    %459 = vector.shape_cast %458 : vector<1x1x8x128xf32> to vector<8x128xf32>
    %460 = vector.shape_cast %449 : vector<8x128xf32> to vector<1x1x8x128xf32>
    tpu.vector_store %arg5[%c5_191, %c0_192, %c0_193, %c0_194], %460 {strides = array<i32>} : memref<8x3x8x128xf32, #tpu.memory_space<vmem>>, vector<1x1x8x128xf32>,
    %c5_195 = arith.constant 5 : index
    %c1_196 = arith.constant 1 : index
    %c0_197 = arith.constant 0 : index
    %c0_198 = arith.constant 0 : index
    %461 = vector.load %arg5[%c5_195, %c1_196, %c0_197, %c0_198] : memref<8x3x8x128xf32, #tpu.memory_space<vmem>>, vector<1x1x8x128xf32>
    %462 = vector.shape_cast %461 : vector<1x1x8x128xf32> to vector<8x128xf32>
    %463 = vector.shape_cast %453 : vector<8x128xf32> to vector<1x1x8x128xf32>
    tpu.vector_store %arg5[%c5_195, %c1_196, %c0_197, %c0_198], %463 {strides = array<i32>} : memref<8x3x8x128xf32, #tpu.memory_space<vmem>>, vector<1x1x8x128xf32>,
    %c5_199 = arith.constant 5 : index
    %c2_200 = arith.constant 2 : index
    %c0_201 = arith.constant 0 : index
    %c0_202 = arith.constant 0 : index
    %464 = vector.load %arg5[%c5_199, %c2_200, %c0_201, %c0_202] : memref<8x3x8x128xf32, #tpu.memory_space<vmem>>, vector<1x1x8x128xf32>
    %465 = vector.shape_cast %464 : vector<1x1x8x128xf32> to vector<8x128xf32>
    %466 = vector.shape_cast %457 : vector<8x128xf32> to vector<1x1x8x128xf32>
    tpu.vector_store %arg5[%c5_199, %c2_200, %c0_201, %c0_202], %466 {strides = array<i32>} : memref<8x3x8x128xf32, #tpu.memory_space<vmem>>, vector<1x1x8x128xf32>,
    %cst_203 = arith.constant 0.215665549 : f32
    %467 = vector.broadcast %cst_203 : f32 to vector<8x128xf32>
    %468 = arith.mulf %467, %258 : vector<8x128xf32>
    %cst_204 = arith.constant 0.431331098 : f32
    %469 = vector.broadcast %cst_204 : f32 to vector<8x128xf32>
    %470 = arith.mulf %469, %265 : vector<8x128xf32>
    %471 = arith.addf %468, %470 : vector<8x128xf32>
    %cst_205 = arith.constant -1.94098985 : f32
    %472 = vector.broadcast %cst_205 : f32 to vector<8x128xf32>
    %473 = arith.mulf %472, %265 : vector<8x128xf32>
    %cst_206 = arith.constant -0.215665549 : f32
    %474 = vector.broadcast %cst_206 : f32 to vector<8x128xf32>
    %475 = arith.mulf %474, %251 : vector<8x128xf32>
    %476 = arith.addf %473, %475 : vector<8x128xf32>
    %cst_207 = arith.constant -0.431331098 : f32
    %477 = vector.broadcast %cst_207 : f32 to vector<8x128xf32>
    %478 = arith.mulf %477, %251 : vector<8x128xf32>
    %cst_208 = arith.constant 1.94098985 : f32
    %479 = vector.broadcast %cst_208 : f32 to vector<8x128xf32>
    %480 = arith.mulf %479, %258 : vector<8x128xf32>
    %481 = arith.addf %478, %480 : vector<8x128xf32>
    %482 = arith.mulf %244, %471 : vector<8x128xf32>
    %483 = arith.mulf %258, %481 : vector<8x128xf32>
    %484 = arith.mulf %265, %476 : vector<8x128xf32>
    %485 = arith.subf %483, %484 : vector<8x128xf32>
    %486 = arith.addf %482, %485 : vector<8x128xf32>
    %487 = arith.mulf %244, %476 : vector<8x128xf32>
    %488 = arith.mulf %265, %471 : vector<8x128xf32>
    %489 = arith.mulf %251, %481 : vector<8x128xf32>
    %490 = arith.subf %488, %489 : vector<8x128xf32>
    %491 = arith.addf %487, %490 : vector<8x128xf32>
    %492 = arith.mulf %244, %481 : vector<8x128xf32>
    %493 = arith.mulf %251, %476 : vector<8x128xf32>
    %494 = arith.mulf %258, %471 : vector<8x128xf32>
    %495 = arith.subf %493, %494 : vector<8x128xf32>
    %496 = arith.addf %492, %495 : vector<8x128xf32>
    %c7 = arith.constant 7 : index
    %c0_209 = arith.constant 0 : index
    %c0_210 = arith.constant 0 : index
    %497 = vector.load %arg4[%c7, %c0_209, %c0_210] : memref<8x8x128xf32, #tpu.memory_space<vmem>>, vector<1x8x128xf32>
    %498 = vector.shape_cast %497 : vector<1x8x128xf32> to vector<8x128xf32>
    %cst_211 = arith.constant -0.970494925 : f32
    %499 = vector.broadcast %cst_211 : f32 to vector<8x128xf32>
    %500 = arith.addf %499, %486 : vector<8x128xf32>
    %501 = arith.mulf %500, %498 : vector<8x128xf32>
    %502 = arith.addf %295, %501 : vector<8x128xf32>
    %cst_212 = arith.constant -0.215665549 : f32
    %503 = vector.broadcast %cst_212 : f32 to vector<8x128xf32>
    %504 = arith.addf %503, %491 : vector<8x128xf32>
    %505 = arith.mulf %504, %498 : vector<8x128xf32>
    %506 = arith.addf %299, %505 : vector<8x128xf32>
    %cst_213 = arith.constant 0.107832775 : f32
    %507 = vector.broadcast %cst_213 : f32 to vector<8x128xf32>
    %508 = arith.addf %507, %496 : vector<8x128xf32>
    %509 = arith.mulf %508, %498 : vector<8x128xf32>
    %510 = arith.addf %301, %509 : vector<8x128xf32>
    %c7_214 = arith.constant 7 : index
    %c0_215 = arith.constant 0 : index
    %c0_216 = arith.constant 0 : index
    %c0_217 = arith.constant 0 : index
    %511 = vector.load %arg5[%c7_214, %c0_215, %c0_216, %c0_217] : memref<8x3x8x128xf32, #tpu.memory_space<vmem>>, vector<1x1x8x128xf32>
    %512 = vector.shape_cast %511 : vector<1x1x8x128xf32> to vector<8x128xf32>
    %513 = vector.shape_cast %502 : vector<8x128xf32> to vector<1x1x8x128xf32>
    tpu.vector_store %arg5[%c7_214, %c0_215, %c0_216, %c0_217], %513 {strides = array<i32>} : memref<8x3x8x128xf32, #tpu.memory_space<vmem>>, vector<1x1x8x128xf32>,
    %c7_218 = arith.constant 7 : index
    %c1_219 = arith.constant 1 : index
    %c0_220 = arith.constant 0 : index
    %c0_221 = arith.constant 0 : index
    %514 = vector.load %arg5[%c7_218, %c1_219, %c0_220, %c0_221] : memref<8x3x8x128xf32, #tpu.memory_space<vmem>>, vector<1x1x8x128xf32>
    %515 = vector.shape_cast %514 : vector<1x1x8x128xf32> to vector<8x128xf32>
    %516 = vector.shape_cast %506 : vector<8x128xf32> to vector<1x1x8x128xf32>
    tpu.vector_store %arg5[%c7_218, %c1_219, %c0_220, %c0_221], %516 {strides = array<i32>} : memref<8x3x8x128xf32, #tpu.memory_space<vmem>>, vector<1x1x8x128xf32>,
    %c7_222 = arith.constant 7 : index
    %c2_223 = arith.constant 2 : index
    %c0_224 = arith.constant 0 : index
    %c0_225 = arith.constant 0 : index
    %517 = vector.load %arg5[%c7_222, %c2_223, %c0_224, %c0_225] : memref<8x3x8x128xf32, #tpu.memory_space<vmem>>, vector<1x1x8x128xf32>
    %518 = vector.shape_cast %517 : vector<1x1x8x128xf32> to vector<8x128xf32>
    %519 = vector.shape_cast %510 : vector<8x128xf32> to vector<1x1x8x128xf32>
    tpu.vector_store %arg5[%c7_222, %c2_223, %c0_224, %c0_225], %519 {strides = array<i32>} : memref<8x3x8x128xf32, #tpu.memory_space<vmem>>, vector<1x1x8x128xf32>,
    %cst_226 = arith.constant -0.702246904 : f32
    %520 = vector.broadcast %cst_226 : f32 to vector<8x128xf32>
    %521 = arith.mulf %520, %353 : vector<8x128xf32>
    %cst_227 = arith.constant -1.87265837 : f32
    %522 = vector.broadcast %cst_227 : f32 to vector<8x128xf32>
    %523 = arith.mulf %522, %360 : vector<8x128xf32>
    %524 = arith.addf %521, %523 : vector<8x128xf32>
    %cst_228 = arith.constant 0.702246904 : f32
    %525 = vector.broadcast %cst_228 : f32 to vector<8x128xf32>
    %526 = arith.mulf %525, %346 : vector<8x128xf32>
    %cst_229 = arith.constant 1.87265837 : f32
    %527 = vector.broadcast %cst_229 : f32 to vector<8x128xf32>
    %528 = arith.mulf %527, %346 : vector<8x128xf32>
    %529 = arith.mulf %339, %524 : vector<8x128xf32>
    %530 = arith.mulf %353, %528 : vector<8x128xf32>
    %531 = arith.mulf %360, %526 : vector<8x128xf32>
    %532 = arith.subf %530, %531 : vector<8x128xf32>
    %533 = arith.addf %529, %532 : vector<8x128xf32>
    %534 = arith.mulf %339, %526 : vector<8x128xf32>
    %535 = arith.mulf %360, %524 : vector<8x128xf32>
    %536 = arith.mulf %346, %528 : vector<8x128xf32>
    %537 = arith.subf %535, %536 : vector<8x128xf32>
    %538 = arith.addf %534, %537 : vector<8x128xf32>
    %539 = arith.mulf %339, %528 : vector<8x128xf32>
    %540 = arith.mulf %346, %526 : vector<8x128xf32>
    %541 = arith.mulf %353, %524 : vector<8x128xf32>
    %542 = arith.subf %540, %541 : vector<8x128xf32>
    %543 = arith.addf %539, %542 : vector<8x128xf32>
    %c3_230 = arith.constant 3 : index
    %c0_231 = arith.constant 0 : index
    %c0_232 = arith.constant 0 : index
    %544 = vector.load %arg4[%c3_230, %c0_231, %c0_232] : memref<8x8x128xf32, #tpu.memory_space<vmem>>, vector<1x8x128xf32>
    %545 = vector.shape_cast %544 : vector<1x8x128xf32> to vector<8x128xf32>
    %546 = arith.mulf %533, %545 : vector<8x128xf32>
    %547 = arith.addf %396, %546 : vector<8x128xf32>
    %cst_233 = arith.constant 0.936329185 : f32
    %548 = vector.broadcast %cst_233 : f32 to vector<8x128xf32>
    %549 = arith.addf %548, %538 : vector<8x128xf32>
    %550 = arith.mulf %549, %545 : vector<8x128xf32>
    %551 = arith.addf %400, %550 : vector<8x128xf32>
    %cst_234 = arith.constant -0.351123452 : f32
    %552 = vector.broadcast %cst_234 : f32 to vector<8x128xf32>
    %553 = arith.addf %552, %543 : vector<8x128xf32>
    %554 = arith.mulf %553, %545 : vector<8x128xf32>
    %555 = arith.addf %404, %554 : vector<8x128xf32>
    %c3_235 = arith.constant 3 : index
    %c0_236 = arith.constant 0 : index
    %c0_237 = arith.constant 0 : index
    %c0_238 = arith.constant 0 : index
    %556 = vector.load %arg5[%c3_235, %c0_236, %c0_237, %c0_238] : memref<8x3x8x128xf32, #tpu.memory_space<vmem>>, vector<1x1x8x128xf32>
    %557 = vector.shape_cast %556 : vector<1x1x8x128xf32> to vector<8x128xf32>
    %558 = vector.shape_cast %547 : vector<8x128xf32> to vector<1x1x8x128xf32>
    tpu.vector_store %arg5[%c3_235, %c0_236, %c0_237, %c0_238], %558 {strides = array<i32>} : memref<8x3x8x128xf32, #tpu.memory_space<vmem>>, vector<1x1x8x128xf32>,
    %c3_239 = arith.constant 3 : index
    %c1_240 = arith.constant 1 : index
    %c0_241 = arith.constant 0 : index
    %c0_242 = arith.constant 0 : index
    %559 = vector.load %arg5[%c3_239, %c1_240, %c0_241, %c0_242] : memref<8x3x8x128xf32, #tpu.memory_space<vmem>>, vector<1x1x8x128xf32>
    %560 = vector.shape_cast %559 : vector<1x1x8x128xf32> to vector<8x128xf32>
    %561 = vector.shape_cast %551 : vector<8x128xf32> to vector<1x1x8x128xf32>
    tpu.vector_store %arg5[%c3_239, %c1_240, %c0_241, %c0_242], %561 {strides = array<i32>} : memref<8x3x8x128xf32, #tpu.memory_space<vmem>>, vector<1x1x8x128xf32>,
    %c3_243 = arith.constant 3 : index
    %c2_244 = arith.constant 2 : index
    %c0_245 = arith.constant 0 : index
    %c0_246 = arith.constant 0 : index
    %562 = vector.load %arg5[%c3_243, %c2_244, %c0_245, %c0_246] : memref<8x3x8x128xf32, #tpu.memory_space<vmem>>, vector<1x1x8x128xf32>
    %563 = vector.shape_cast %562 : vector<1x1x8x128xf32> to vector<8x128xf32>
    %564 = vector.shape_cast %555 : vector<8x128xf32> to vector<1x1x8x128xf32>
    tpu.vector_store %arg5[%c3_243, %c2_244, %c0_245, %c0_246], %564 {strides = array<i32>} : memref<8x3x8x128xf32, #tpu.memory_space<vmem>>, vector<1x1x8x128xf32>,
    return
  }
  func.func @transform_0(%arg0: i32) -> (i32, i32, i32) {
    %c0_i32 = arith.constant 0 : i32
    %c0_i32_0 = arith.constant 0 : i32
    %c0_i32_1 = arith.constant 0 : i32
    return %c0_i32, %arg0, %c0_i32_0 : i32, i32, i32
  }
  func.func @transform_1(%arg0: i32) -> (i32, i32, i32) {
    %c0_i32 = arith.constant 0 : i32
    %c0_i32_0 = arith.constant 0 : i32
    %c0_i32_1 = arith.constant 0 : i32
    return %c0_i32, %arg0, %c0_i32_0 : i32, i32, i32
  }
  func.func @transform_2(%arg0: i32) -> (i32, i32, i32, i32) {
    %c0_i32 = arith.constant 0 : i32
    %c0_i32_0 = arith.constant 0 : i32
    %c0_i32_1 = arith.constant 0 : i32
    %c0_i32_2 = arith.constant 0 : i32
    return %c0_i32, %c0_i32_0, %arg0, %c0_i32_1 : i32, i32, i32, i32
  }
  func.func @transform_3(%arg0: i32) -> (i32, i32, i32) {
    %c0_i32 = arith.constant 0 : i32
    %c0_i32_0 = arith.constant 0 : i32
    %c0_i32_1 = arith.constant 0 : i32
    return %c0_i32, %arg0, %c0_i32_0 : i32, i32, i32
  }
  func.func @transform_4(%arg0: i32) -> (i32, i32, i32, i32) {
    %c0_i32 = arith.constant 0 : i32
    %c0_i32_0 = arith.constant 0 : i32
    %c0_i32_1 = arith.constant 0 : i32
    %c0_i32_2 = arith.constant 0 : i32
    return %c0_i32, %c0_i32_0, %arg0, %c0_i32_1 : i32, i32, i32, i32
  }
}

</mosaic_0001>

<bundles_post_ra>
// kernel: tpu_custom_call.1
= control target key start
LH: loop header
LB: loop body
LE: loop exit
PB: predicated region body
PF: predicated region fallthrough
CT: control target
= control target key end

     0   :  { %9 = vsyncpa [#allocation3], 0  ;;  %s1076_s0 = inlined_call_operand.hbm [shape: f32[4,8,128], index: 0, kind: input, shape index: {}]   ;;  %s1077_s1 = inlined_call_operand.hbm [shape: f32[3,8,128], index: 1, kind: input, shape index: {}]   ;;  %s1078_s2 = inlined_call_operand.hbm [shape: f32[4,4,8,128], index: 2, kind: input, shape index: {}]   ;;  %s1079_s3 = inlined_call_operand.hbm [shape: f32[8,8,128], index: 3, kind: input, shape index: {}]   ;;  %s1080_s4 = inlined_call_operand.hbm [shape: f32[8,3,8,128], index: 4, kind: output, shape index: {}]  }
   0x1   :  { %10 = vsyncpa [#allocation6], 0 }
   0x2   :  { %11 = vsyncpa [#allocation9], 0 }
   0x3   :  { %12 = vsyncpa [#allocation4], 0  ;;  %s695_s15 = smov [#allocation5]   ;;  %s696_s17 = smov [#allocation2]  }
   0x4   :  { %s30_s16 = sshll.u32 %s695_s15, 4  ;;  %s18_s18 = sshll.u32 %s696_s17, 4  ;;  %s31_s16 = int_to_ptr.vmem [resolvable:$true] %s30_s16  ;;  %s19_s18 = int_to_ptr.vmem [resolvable:$true] %s18_s18 }
   0x5   :  { %s595_s19 = scalar_lea.vmem %s31_s16, 384  ;;  %p600_p1 = scmp.lt.s32.totalorder %s31_s16, %s31_s16 }
   0x6   :  { %p596_p0 = scmp.ne.s32.totalorder %s31_s16, %s595_s19  ;;  %p601_p2 = scmp.lt.s32.totalorder %s595_s19, %s595_s19 }
   0x8   :  { %p602_p3 = por %p601_p2, %p600_p1 }
   0xa   :  { %p603_p4 = pnand %p602_p3, %p596_p0 }
   0xc   :  { %606 = shalt.err (!%p603_p4)
}
   0xd   :  { %s697_s20 = smov 128   ;;  %s698_s21 = smov 8  }
   0xe   :  { %36 = dma.hbm_to_vmem [thread:$0]  %s1077_s1, 384, %s31_s16, [#allocation6], %s697_s20, %s697_s20, %s698_s21  }
   0xf   :  { %s615_s24 = scalar_lea.vmem %s19_s18, 512  ;;  %p620_p6 = scmp.lt.s32.totalorder %s19_s18, %s19_s18 }
  0x10   :  { %p616_p5 = scmp.ne.s32.totalorder %s19_s18, %s615_s24  ;;  %p621_p7 = scmp.lt.s32.totalorder %s615_s24, %s615_s24 }
  0x12   :  { %p622_p8 = por %p621_p7, %p620_p6 }
  0x14   :  { %p623_p9 = pnand %p622_p8, %p616_p5 }
  0x16   :  { %626 = shalt.err (!%p623_p9)
}
  0x17   :  { %24 = dma.hbm_to_vmem [thread:$0]  %s1076_s0, 512, %s19_s18, [#allocation3], %s697_s20, %s697_s20, %s698_s21  }
  0x18   :  { %s699_s27 = smov [#allocation7]   ;;  %s700_s29 = smov [#allocation8]  }
  0x19   :  { %s42_s28 = sshll.u32 %s699_s27, 4  ;;  %s54_s30 = sshll.u32 %s700_s29, 4  ;;  %s43_s28 = int_to_ptr.vmem [resolvable:$true] %s42_s28  ;;  %s55_s30 = int_to_ptr.vmem [resolvable:$true] %s54_s30 }
  0x1a   :  { %s635_s1 = scalar_lea.vmem %s43_s28, 2048  ;;  %p640_p11 = scmp.lt.s32.totalorder %s43_s28, %s43_s28 }
  0x1b   :  { %p636_p10 = scmp.ne.s32.totalorder %s43_s28, %s635_s1  ;;  %p641_p12 = scmp.lt.s32.totalorder %s635_s1, %s635_s1 }
  0x1d   :  { %p642_p13 = por %p641_p12, %p640_p11 }
  0x1f   :  { %p643_p0 = pnand %p642_p13, %p636_p10 }
  0x21   :  { %646 = shalt.err (!%p643_p0)
}
  0x22   :  { %48 = dma.hbm_to_vmem [thread:$0]  %s1078_s2, 2048, %s43_s28, [#allocation6], %s697_s20, %s697_s20, %s698_s21  }
  0x23   :  { %s655_s0 = scalar_lea.vmem %s55_s30, 1024  ;;  %p660_p2 = scmp.lt.s32.totalorder %s55_s30, %s55_s30 }
  0x24   :  { %p656_p1 = scmp.ne.s32.totalorder %s55_s30, %s655_s0  ;;  %p661_p3 = scmp.lt.s32.totalorder %s655_s0, %s655_s0 }
  0x26   :  { %p662_p4 = por %p661_p3, %p660_p2 }
  0x28   :  { %p663_p5 = pnand %p662_p4, %p656_p1 }
  0x2a   :  { %666 = shalt.err (!%p663_p5)
}
  0x2b   :  { %60 = dma.hbm_to_vmem [thread:$0]  %s1079_s3, 1024, %s55_s30, [#allocation9], %s697_s20, %s697_s20, %s698_s21  }
  0x2c   :  { %687 = dma.done.wait [#allocation3], 512  }
  0x2d   :  { %688 = vsyncadd [#allocation3], 4294966784 }
  0x2e   :  { %689 = dma.done.wait [#allocation6], 2432  }
  0x2f   :  { %690 = vsyncadd [#allocation6], 4294964864 }
  0x30   :  { %691 = dma.done.wait [#allocation9], 1024  }
  0x31   :  { %692 = vsyncadd [#allocation9], 4294966272  ;;  %v751_v0 = vld [vmem:[#allocation5] sm:$0xff]  ;;  %v753_v1 = vld [vmem:[#allocation5 + $0x8] sm:$0xff]  ;;  %s701_s2 = smov [#allocation10]  }
  0x32   :  { %v755_v2 = vld [vmem:[#allocation5 + $0x10] sm:$0xff]  ;;  %98 = vst [vmem:[#allocation10] sm:$0xff] %v751_v0  ;;  %100 = vst [vmem:[#allocation10 + $0x8] sm:$0xff] %v753_v1  ;;  %v760_v3 = vld [vmem:[#allocation2] sm:$0xff]  ;;  %s556_s3 = sshll.u32 %s701_s2, 4  ;;  %s557_s3 = int_to_ptr.vmem [resolvable:$true] %s556_s3 }
  0x33   :  { %102 = vst [vmem:[#allocation10 + $0x10] sm:$0xff] %v755_v2  ;;  %v75_v4 = vld [vmem:[#allocation2 + $0x8] sm:$0xff]  ;;  %v762_v5 = vld [vmem:[#allocation2 + $0x10] sm:$0xff]  ;;  %v79_v6 = vld [vmem:[#allocation2 + $0x18] sm:$0xff]  ;;  %v80_v7 = vmul.f32 %v760_v3, %v760_v3  ;;  %s667_s9 = scalar_lea.vmem %s557_s3, 3072  ;;  %p672_p7 = scmp.lt.s32.totalorder %s557_s3, %s557_s3 }
  0x34   :  { %v81_v8 = vmul.f32 %v75_v4, %v75_v4  ;;  %v83_v9 = vmul.f32 %v762_v5, %v762_v5  ;;  %v768_v10 = vld [vmem:[#allocation7] sm:$0xff]  ;;  %v770_v11 = vld [vmem:[#allocation7 + $0x8] sm:$0xff]  ;;  %v85_v13 = vmul.f32 %v79_v6, %v79_v6  ;;  %v772_v14 = vld [vmem:[#allocation7 + $0x10] sm:$0xff]  ;;  %p668_p6 = scmp.ne.s32.totalorder %s557_s3, %s667_s9  ;;  %p673_p8 = scmp.lt.s32.totalorder %s667_s9, %s667_s9 }
  0x35   :  { %v774_v15 = vld [vmem:[#allocation7 + $0x18] sm:$0xff]  ;;  %v110_v16 = vmul.f32 %v768_v10, %v768_v10  ;;  %v111_v17 = vmul.f32 %v770_v11, %v770_v11  ;;  %v113_v18 = vmul.f32 %v772_v14, %v772_v14  ;;  %v784_v20 = vld [vmem:[#allocation7 + $0x20] sm:$0xff]  ;;  %v786_v21 = vld [vmem:[#allocation7 + $0x28] sm:$0xff] }
  0x36   :  { %v82_v12 = vadd.f32 %v81_v8, %v80_v7  ;;  %v115_v19 = vmul.f32 %v774_v15, %v774_v15  ;;  %v186_v24 = vmul.f32 %v784_v20, %v784_v20  ;;  %v187_v25 = vmul.f32 %v786_v21, %v786_v21  ;;  %v792_v26 = vld [vmem:[#allocation7 + $0x40] sm:$0xff]  ;;  %v794_v27 = vld [vmem:[#allocation7 + $0x30] sm:$0xff]  ;;  %v796_v28 = vld [vmem:[#allocation7 + $0x48] sm:$0xff]  ;;  %p674_p9 = por %p673_p8, %p672_p7 }
  0x37   :  { %v112_v23 = vadd.f32 %v111_v17, %v110_v16  ;;  %v271_v29 = vmul.f32 %v792_v26, %v792_v26  ;;  %v800_v32 = vld [vmem:[#allocation7 + $0x50] sm:$0xff]  ;;  %v272_v33 = vmul.f32 %v796_v28, %v796_v28  ;;  %v804_v34 = vld [vmem:[#allocation7 + $0x60] sm:$0xff]  ;;  %v806_v35 = vld [vmem:[#allocation7 + $0x68] sm:$0xff]  ;;  %v189_v39 = vmul.f32 %v794_v27, %v794_v27 }
  0x38   :  { %v84_v22 = vadd.f32 %v83_v9, %v82_v12  ;;  %v188_v38 = vadd.f32 %v187_v25, %v186_v24  ;;  %v810_v40 = vld [vmem:[#allocation7 + $0x38] sm:$0xff]  ;;  %v274_v42 = vmul.f32 %v800_v32, %v800_v32  ;;  %v351_v43 = vmul.f32 %v804_v34, %v804_v34  ;;  %v820_v47 = vld [vmem:[#allocation7 + $0x70] sm:$0xff]  ;;  %p675_p10 = pnand %p674_p9, %p668_p6 }
  0x39   :  { %v114_v31 = vadd.f32 %v113_v18, %v112_v23  ;;  %v273_v41 = vadd.f32 %v272_v33, %v271_v29  ;;  %v352_v44 = vmul.f32 %v806_v35, %v806_v35  ;;  %v818_v46 = vld [vmem:[#allocation7 + $0x58] sm:$0xff]  ;;  %v191_v49 = vmul.f32 %v810_v40, %v810_v40  ;;  %v164_v29 = vld [vmem:[#allocation8 + $0x8] sm:$0xff] }
  0x3a   :  { %v86_v30 = vadd.f32 %v85_v13, %v84_v22  ;;  %v190_v48 = vadd.f32 %v189_v39, %v188_v38  ;;  %v276_v51 = vmul.f32 %v818_v46, %v818_v46  ;;  %v354_v53 = vmul.f32 %v820_v47, %v820_v47  ;;  %v828_v54 = vld [vmem:[#allocation7 + $0x78] sm:$0xff] }
  0x3b   :  { %v116_v37 = vadd.f32 %v115_v19, %v114_v31  ;;  %v275_v50 = vadd.f32 %v274_v42, %v273_v41  ;;  %v353_v52 = vadd.f32 %v352_v44, %v351_v43  ;;  %v356_v58 = vmul.f32 %v828_v54, %v828_v54 }
  0x3c   :  { %v87_v36 = vadd.f32 1e-16, %v86_v30  ;;  %v192_v55 = vadd.f32 %v191_v49, %v190_v48 }
  0x3d   :  { %v117_v45 = vadd.f32 1e-16, %v116_v37  ;;  %v277_v56 = vadd.f32 %v276_v51, %v275_v50  ;;  %v355_v57 = vadd.f32 %v354_v53, %v353_v52 }
  0x3e   :  { %577 = vrsqrt.f32 %v87_v36  ;;  %v193_v59 = vadd.f32 1e-16, %v192_v55 }
  0x3f   :  { %579 = vrsqrt.f32 %v117_v45  ;;  %v278_v60 = vadd.f32 1e-16, %v277_v56  ;;  %v357_v61 = vadd.f32 %v356_v58, %v355_v57 }
  0x40   :  { %581 = vrsqrt.f32 %v193_v59 }
  0x41   :  { %583 = vrsqrt.f32 %v278_v60  ;;  %v844_v13 = vadd.f32 1e-16, %v357_v61 }
  0x43   :  { %585 = vrsqrt.f32 %v844_v13 }
  0x4b   :  { %v578_v62 = vpop.eup %577 }
  0x4c   :  { %v832_v63 = vmul.f32 %v578_v62, %v75_v4  ;;  %v834_v7 = vmul.f32 %v578_v62, %v79_v6  ;;  %v836_v8 = vpop.eup %579  ;;  %v839_v9 = vmul.f32 %v578_v62, %v760_v3  ;;  %v842_v12 = vmul.f32 %v578_v62, %v762_v5 }
  0x4d   :  { %v855_v5 = vmul.f32 %v836_v8, %v768_v10 }
  0x4e   :  { %v151_v16 = vmul.f32 -2.0, %v834_v7  ;;  %v152_v17 = vmul.f32 2.0, %v832_v63  ;;  %v227_v4 = vmul.f32 -0.19900744, %v834_v7  ;;  %v228_v6 = vmul.f32 1.9900743, %v834_v7 }
  0x4f   :  { %v229_v18 = vmul.f32 0.19900744, %v832_v63  ;;  %v230_v19 = vmul.f32 -1.9900743, %v842_v12  ;;  %v312_v3 = vmul.f32 -1.9900743, %v834_v7 }
  0x50   :  { %v153_v22 = vmul.f32 %v151_v16, %v839_v9  ;;  %v154_v23 = vmul.f32 %v152_v17, %v842_v12  ;;  %v156_v24 = vmul.f32 %v151_v16, %v834_v7  ;;  %v157_v25 = vmul.f32 %v152_v17, %v832_v63 }
  0x51   :  { %v159_v30 = vmul.f32 %v152_v17, %v839_v9  ;;  %v160_v31 = vmul.f32 %v151_v16, %v842_v12  ;;  %v231_v33 = vadd.f32 %v230_v19, %v229_v18  ;;  %v232_v36 = vmul.f32 %v227_v4, %v839_v9 }
  0x52   :  { %v155_v37 = vadd.f32 %v154_v23, %v153_v22  ;;  %v158_v38 = vsub.f32 %v156_v24, %v157_v25  ;;  %v234_v10 = vmul.f32 %v228_v6, %v834_v7  ;;  %v237_v39 = vmul.f32 %v228_v6, %v839_v9  ;;  %v883_v23 = vpop.eup %581 }
  0x53   :  { %v161_v41 = vsub.f32 0.0, %v160_v31  ;;  %v233_v42 = vmul.f32 %v231_v33, %v842_v12  ;;  %v238_v43 = vmul.f32 %v227_v4, %v834_v7  ;;  %v239_v44 = vmul.f32 %v231_v33, %v832_v63  ;;  %v888_v31 = vpop.eup %583 }
  0x54   :  { %v165_v45 = vmul.f32 %v164_v29, %v155_v37  ;;  %v167_v48 = vadd.f32 1.0, %v158_v38  ;;  %v242_v49 = vmul.f32 %v231_v33, %v839_v9  ;;  %v243_v50 = vmul.f32 %v228_v6, %v832_v63  ;;  %v248_v6 = vld [vmem:[#allocation8 + $0x20] sm:$0xff] }
  0x55   :  { %v162_v51 = vadd.f32 %v161_v41, %v159_v30  ;;  %v235_v52 = vsub.f32 %v233_v42, %v234_v10  ;;  %v240_v53 = vsub.f32 %v238_v43, %v239_v44  ;;  %v244_v55 = vmul.f32 %v227_v4, %v842_v12  ;;  %v328_v41 = vld [vmem:[#allocation8 + $0x30] sm:$0xff] }
  0x56   :  { %v873_v56 = vadd.f32 %v165_v45, %v751_v0  ;;  %v168_v57 = vmul.f32 %v167_v48, %v164_v29  ;;  %v313_v58 = vmul.f32 1.9900743, %v842_v12  ;;  %v316_v59 = vmul.f32 %v312_v3, %v834_v7 }
  0x57   :  { %v170_v60 = vmul.f32 %v164_v29, %v162_v51  ;;  %v236_v61 = vadd.f32 %v235_v52, %v232_v36  ;;  %v241_v62 = vadd.f32 %v240_v53, %v237_v39  ;;  %v245_v16 = vsub.f32 %v243_v50, %v244_v55 }
  0x58   :  { %173 = vst [vmem:[#allocation10 + $0x18] sm:$0xff] %v873_v56  ;;  %v879_v17 = vadd.f32 %v168_v57, %v753_v1  ;;  %v314_v19 = vadd.f32 %v313_v58, %v229_v18  ;;  %v319_v4 = vmul.f32 %v312_v3, %v839_v9  ;;  %v324_v22 = vmul.f32 %v312_v3, %v832_v63 }
  0x59   :  { %v886_v24 = vadd.f32 %v170_v60, %v755_v2  ;;  %v249_v25 = vadd.f32 0.99503714, %v236_v61  ;;  %v252_v29 = vadd.f32 0.09950372, %v241_v62  ;;  %v246_v30 = vadd.f32 %v245_v16, %v242_v49 }
  0x5a   :  { %175 = vst [vmem:[#allocation10 + $0x20] sm:$0xff] %v879_v17  ;;  %v315_v33 = vmul.f32 %v314_v19, %v842_v12  ;;  %v320_v18 = vmul.f32 %v314_v19, %v832_v63  ;;  %v323_v37 = vmul.f32 %v314_v19, %v839_v9  ;;  %v325_v38 = vsub.f32 %v324_v22, %v244_v55 }
  0x5b   :  { %177 = vst [vmem:[#allocation10 + $0x28] sm:$0xff] %v886_v24  ;;  %v250_v3 = vmul.f32 %v249_v25, %v248_v6  ;;  %v253_v10 = vmul.f32 %v252_v29, %v248_v6  ;;  %v255_v39 = vmul.f32 %v248_v6, %v246_v30  ;;  %v120_v42 = vmul.f32 %v836_v8, %v770_v11 }
  0x5c   :  { %v317_v44 = vsub.f32 %v315_v33, %v316_v59  ;;  %v321_v45 = vsub.f32 %v238_v43, %v320_v18  ;;  %v326_v48 = vadd.f32 %v325_v38, %v323_v37  ;;  %v121_v49 = vmul.f32 %v836_v8, %v772_v14 }
  0x5d   :  { %v900_v50 = vadd.f32 %v250_v3, %v751_v0  ;;  %v903_v51 = vadd.f32 %v253_v10, %v753_v1  ;;  %v906_v52 = vadd.f32 %v255_v39, %v755_v2  ;;  %v122_v53 = vmul.f32 %v836_v8, %v774_v15 }
  0x5e   :  { %v318_v55 = vadd.f32 %v317_v44, %v232_v36  ;;  %v322_v11 = vadd.f32 %v321_v45, %v319_v4  ;;  %v335_v57 = vmul.f32 %v328_v41, %v326_v48  ;;  %v123_v43 = vmul.f32 %v855_v5, %v839_v9 }
  0x5f   :  { %258 = vst [vmem:[#allocation10 + $0x60] sm:$0xff] %v900_v50  ;;  %260 = vst [vmem:[#allocation10 + $0x68] sm:$0xff] %v903_v51  ;;  %v124_v14 = vmul.f32 %v120_v42, %v832_v63  ;;  %v126_v58 = vmul.f32 %v121_v49, %v842_v12  ;;  %v128_v59 = vmul.f32 %v122_v53, %v834_v7 }
  0x60   :  { %262 = vst [vmem:[#allocation10 + $0x70] sm:$0xff] %v906_v52  ;;  %v130_v15 = vmul.f32 %v120_v42, %v839_v9  ;;  %v329_v8 = vadd.f32 -0.99503714, %v318_v55  ;;  %v332_v36 = vadd.f32 0.09950372, %v322_v11  ;;  %v920_v60 = vadd.f32 %v335_v57, %v755_v2 }
  0x61   :  { %v131_v61 = vmul.f32 %v855_v5, %v832_v63  ;;  %v125_v62 = vsub.f32 %v123_v43, %v124_v14  ;;  %v133_v16 = vmul.f32 %v122_v53, %v842_v12  ;;  %v135_v6 = vmul.f32 %v121_v49, %v834_v7 }
  0x62   :  { %v137_v19 = vmul.f32 %v121_v49, %v839_v9  ;;  %v330_v4 = vmul.f32 %v329_v8, %v328_v41  ;;  %v333_v22 = vmul.f32 %v332_v36, %v328_v41  ;;  %342 = vst [vmem:[#allocation10 + $0xa0] sm:$0xff] %v920_v60  ;;  %v138_v29 = vmul.f32 %v122_v53, %v832_v63 }
  0x63   :  { %v132_v25 = vadd.f32 %v131_v61, %v130_v15  ;;  %v127_v30 = vsub.f32 %v125_v62, %v126_v58  ;;  %v140_v2 = vmul.f32 %v855_v5, %v842_v12  ;;  %v142_v33 = vmul.f32 %v120_v42, %v834_v7 }
  0x64   :  { %v144_v18 = vmul.f32 %v122_v53, %v839_v9  ;;  %v934_v37 = vadd.f32 %v330_v4, %v751_v0  ;;  %v937_v38 = vadd.f32 %v333_v22, %v753_v1  ;;  %v139_v10 = vsub.f32 %v137_v19, %v138_v29 }
  0x65   :  { %v134_v3 = vadd.f32 %v133_v16, %v132_v25  ;;  %v145_v39 = vmul.f32 %v121_v49, %v832_v63  ;;  %v147_v41 = vmul.f32 %v120_v42, %v842_v12  ;;  %v195_v0 = vmul.f32 %v883_v23, %v784_v20 }
  0x66   :  { %338 = vst [vmem:[#allocation10 + $0x90] sm:$0xff] %v934_v37  ;;  %340 = vst [vmem:[#allocation10 + $0x98] sm:$0xff] %v937_v38  ;;  %v141_v45 = vadd.f32 %v140_v2, %v139_v10  ;;  %v196_v1 = vmul.f32 %v883_v23, %v786_v21  ;;  %v950_v48 = vsub.f32 %v127_v30, %v128_v59 }
  0x67   :  { %v944_v44 = vsub.f32 %v134_v3, %v135_v6  ;;  %v146_v49 = vadd.f32 %v145_v39, %v144_v18  ;;  %v149_v42 = vmul.f32 %v855_v5, %v834_v7  ;;  %v197_v13 = vmul.f32 %v883_v23, %v794_v27 }
  0x68   :  { %v956_v53 = vadd.f32 %v142_v33, %v141_v45  ;;  %v198_v11 = vmul.f32 %v883_v23, %v810_v40  ;;  %v199_v20 = vmul.f32 %v195_v0, %v839_v9  ;;  %v200_v43 = vmul.f32 %v196_v1, %v832_v63 }
  0x69   :  { %v398_v55 = vmul.f32 1.9409899, %v944_v44  ;;  %v148_v57 = vsub.f32 %v146_v49, %v147_v41  ;;  %v396_v21 = vmul.f32 -0.21566555, %v944_v44  ;;  %v202_v14 = vmul.f32 %v197_v13, %v842_v12 }
  0x6a   :  { %v392_v5 = vmul.f32 0.21566555, %v956_v53  ;;  %v399_v27 = vmul.f32 -0.4313311, %v956_v53  ;;  %v206_v58 = vmul.f32 %v196_v1, %v839_v9  ;;  %v207_v59 = vmul.f32 %v195_v0, %v832_v63 }
  0x6b   :  { %v969_v15 = vadd.f32 %v149_v42, %v148_v57  ;;  %v201_v40 = vsub.f32 %v199_v20, %v200_v43  ;;  %v209_v23 = vmul.f32 %v198_v11, %v842_v12  ;;  %v211_v8 = vmul.f32 %v197_v13, %v834_v7  ;;  %v989_v43 = vpop.eup %585 }
  0x6c   :  { %v400_v36 = vadd.f32 %v399_v27, %v398_v55  ;;  %v208_v61 = vadd.f32 %v207_v59, %v206_v58  ;;  %v213_v62 = vmul.f32 %v197_v13, %v839_v9  ;;  %v214_v16 = vmul.f32 %v198_v11, %v832_v63 }
  0x6d   :  { %v393_v6 = vmul.f32 -1.9409899, %v969_v15  ;;  %v395_v19 = vmul.f32 0.4313311, %v969_v15  ;;  %v203_v4 = vsub.f32 %v201_v40, %v202_v14  ;;  %v204_v22 = vmul.f32 %v198_v11, %v834_v7 }
  0x6e   :  { %v402_v25 = vmul.f32 %v400_v36, %v956_v53  ;;  %v408_v29 = vmul.f32 %v400_v36, %v944_v44  ;;  %v210_v30 = vadd.f32 %v209_v23, %v208_v61  ;;  %v216_v2 = vmul.f32 %v195_v0, %v842_v12 }
  0x6f   :  { %v394_v33 = vadd.f32 %v393_v6, %v392_v5  ;;  %v397_v18 = vadd.f32 %v396_v21, %v395_v19  ;;  %v411_v3 = vmul.f32 %v400_v36, %v950_v48  ;;  %v215_v10 = vsub.f32 %v213_v62, %v214_v16  ;;  %v417_v19 = vld [vmem:[#allocation8 + $0x10] sm:$0xff] }
  0x70   :  { %v212_v39 = vsub.f32 %v210_v30, %v211_v8  ;;  %v218_v41 = vmul.f32 %v196_v1, %v834_v7  ;;  %v220_v45 = vmul.f32 %v198_v11, %v839_v9  ;;  %v221_v49 = vmul.f32 %v197_v13, %v832_v63 }
  0x71   :  { %v401_v42 = vmul.f32 %v394_v33, %v950_v48  ;;  %v403_v55 = vmul.f32 %v397_v18, %v969_v15  ;;  %v406_v20 = vmul.f32 %v397_v18, %v950_v48  ;;  %v407_v57 = vmul.f32 %v394_v33, %v969_v15 }
  0x72   :  { %v412_v21 = vmul.f32 %v397_v18, %v944_v44  ;;  %v413_v14 = vmul.f32 %v394_v33, %v956_v53  ;;  %v217_v5 = vadd.f32 %v216_v2, %v215_v10  ;;  %v222_v27 = vadd.f32 %v221_v49, %v220_v45 }
  0x73   :  { %v404_v58 = vsub.f32 %v402_v25, %v403_v55  ;;  %v409_v11 = vsub.f32 %v407_v57, %v408_v29  ;;  %v223_v13 = vmul.f32 %v196_v1, %v842_v12  ;;  %v225_v59 = vmul.f32 %v195_v0, %v834_v7 }
  0x74   :  { %v414_v40 = vsub.f32 %v412_v21, %v413_v14  ;;  %v219_v23 = vadd.f32 %v218_v41, %v217_v5  ;;  %v439_v8 = vmul.f32 -0.4313311, %v212_v39  ;;  %v997_v36 = vmul.f32 %v888_v31, %v792_v26 }
  0x75   :  { %v405_v61 = vadd.f32 %v404_v58, %v401_v42  ;;  %v410_v62 = vadd.f32 %v409_v11, %v406_v20  ;;  %v205_v16 = vsub.f32 %v203_v4, %v204_v22  ;;  %v224_v6 = vsub.f32 %v222_v27, %v223_v13 }
  0x76   :  { %v415_v30 = vadd.f32 %v414_v40, %v411_v3  ;;  %v437_v2 = vmul.f32 -0.21566555, %v212_v39  ;;  %v440_v25 = vmul.f32 -1.9409899, %v219_v23  ;;  %v281_v1 = vmul.f32 %v888_v31, %v796_v28 }
  0x77   :  { %v418_v29 = vadd.f32 0.21566555, %v405_v61  ;;  %v421_v0 = vadd.f32 0.9704949, %v410_v62  ;;  %v226_v33 = vadd.f32 %v225_v59, %v224_v6  ;;  %v433_v18 = vmul.f32 0.21566555, %v219_v23 }
  0x78   :  { %v424_v10 = vadd.f32 0.107832775, %v415_v30  ;;  %v441_v41 = vadd.f32 %v440_v25, %v439_v8  ;;  %v284_v26 = vmul.f32 %v997_v36, %v839_v9  ;;  %v285_v45 = vmul.f32 %v281_v1, %v832_v63 }
  0x79   :  { %v419_v4 = vmul.f32 %v418_v29, %v417_v19  ;;  %v422_v22 = vmul.f32 %v421_v0, %v417_v19  ;;  %v434_v49 = vmul.f32 0.4313311, %v226_v33  ;;  %v436_v3 = vmul.f32 1.9409899, %v226_v33  ;;  %v458_v0 = vld [vmem:[#allocation8 + $0x28] sm:$0xff] }
  0x7a   :  { %v425_v42 = vmul.f32 %v424_v10, %v417_v19  ;;  %v443_v55 = vmul.f32 %v441_v41, %v219_v23  ;;  %v449_v20 = vmul.f32 %v441_v41, %v212_v39  ;;  %v282_v28 = vmul.f32 %v888_v31, %v800_v32 }
  0x7b   :  { %v1007_v57 = vadd.f32 %v419_v4, %v873_v56  ;;  %v1010_v21 = vadd.f32 %v422_v22, %v879_v17  ;;  %v435_v14 = vadd.f32 %v434_v49, %v433_v18  ;;  %v438_v5 = vadd.f32 %v437_v2, %v436_v3 }
  0x7c   :  { %v1013_v27 = vadd.f32 %v425_v42, %v886_v24  ;;  %v452_v58 = vmul.f32 %v441_v41, %v205_v16  ;;  %v283_v11 = vmul.f32 %v888_v31, %v818_v46  ;;  %v286_v13 = vsub.f32 %v284_v26, %v285_v45 }
  0x7d   :  { %428 = vst [vmem:[#allocation10 + $0x30] sm:$0xff] %v1007_v57  ;;  %430 = vst [vmem:[#allocation10 + $0x38] sm:$0xff] %v1010_v21  ;;  %v442_v32 = vmul.f32 %v435_v14, %v205_v16  ;;  %v444_v56 = vmul.f32 %v438_v5, %v226_v33  ;;  %v447_v59 = vmul.f32 %v438_v5, %v205_v16 }
  0x7e   :  { %v448_v40 = vmul.f32 %v435_v14, %v226_v33  ;;  %432 = vst [vmem:[#allocation10 + $0x40] sm:$0xff] %v1013_v27  ;;  %v453_v17 = vmul.f32 %v438_v5, %v212_v39  ;;  %v454_v8 = vmul.f32 %v435_v14, %v219_v23  ;;  %v287_v24 = vmul.f32 %v282_v28, %v842_v12 }
  0x7f   :  { %v291_v61 = vmul.f32 %v281_v1, %v839_v9  ;;  %v445_v62 = vsub.f32 %v443_v55, %v444_v56  ;;  %v292_v46 = vmul.f32 %v997_v36, %v832_v63  ;;  %v294_v31 = vmul.f32 %v283_v11, %v842_v12 }
  0x80   :  { %v450_v6 = vsub.f32 %v448_v40, %v449_v20  ;;  %v455_v19 = vsub.f32 %v453_v17, %v454_v8  ;;  %v289_v30 = vmul.f32 %v283_v11, %v834_v7  ;;  %v296_v16 = vmul.f32 %v282_v28, %v834_v7 }
  0x81   :  { %v298_v2 = vmul.f32 %v282_v28, %v839_v9  ;;  %v446_v39 = vadd.f32 %v445_v62, %v442_v32  ;;  %v293_v25 = vadd.f32 %v292_v46, %v291_v61  ;;  %v299_v29 = vmul.f32 %v283_v11, %v832_v63 }
  0x82   :  { %v451_v23 = vadd.f32 %v450_v6, %v447_v59  ;;  %v456_v33 = vadd.f32 %v455_v19, %v452_v58  ;;  %v301_v18 = vmul.f32 %v997_v36, %v842_v12  ;;  %v303_v10 = vmul.f32 %v281_v1, %v834_v7 }
  0x83   :  { %v305_v41 = vmul.f32 %v283_v11, %v839_v9  ;;  %v459_v26 = vadd.f32 0.9704949, %v446_v39  ;;  %v295_v4 = vadd.f32 %v294_v31, %v293_v25  ;;  %v300_v22 = vsub.f32 %v298_v2, %v299_v29 }
  0x84   :  { %v462_v45 = vadd.f32 -0.21566555, %v451_v23  ;;  %v465_v49 = vadd.f32 0.107832775, %v456_v33  ;;  %v288_v3 = vsub.f32 %v286_v13, %v287_v24  ;;  %v306_v42 = vmul.f32 %v282_v28, %v832_v63 }
  0x85   :  { %v308_v55 = vmul.f32 %v281_v1, %v842_v12  ;;  %v460_v20 = vmul.f32 %v459_v26, %v458_v0  ;;  %v297_v5 = vsub.f32 %v295_v4, %v296_v16  ;;  %v302_v58 = vadd.f32 %v301_v18, %v300_v22 }
  0x86   :  { %v463_v14 = vmul.f32 %v462_v45, %v458_v0  ;;  %v466_v32 = vmul.f32 %v465_v49, %v458_v0  ;;  %v307_v56 = vadd.f32 %v306_v42, %v305_v41  ;;  %v310_v59 = vmul.f32 %v997_v36, %v834_v7 }
  0x87   :  { %v361_v9 = vmul.f32 %v989_v43, %v806_v35  ;;  %v461_v11 = vadd.f32 %v460_v20, %v900_v50  ;;  %v304_v40 = vadd.f32 %v303_v10, %v302_v58  ;;  %v360_v63 = vmul.f32 %v989_v43, %v804_v34 }
  0x88   :  { %v464_v13 = vadd.f32 %v463_v14, %v903_v51  ;;  %v467_v12 = vadd.f32 %v466_v32, %v906_v52  ;;  %v309_v1 = vsub.f32 %v307_v56, %v308_v55  ;;  %v478_v28 = vmul.f32 -0.21566555, %v297_v5 }
  0x89   :  { %v480_v17 = vmul.f32 -0.4313311, %v297_v5  ;;  %469 = vst [vmem:[#allocation10 + $0x78] sm:$0xff] %v461_v11  ;;  %v481_v8 = vmul.f32 1.9409899, %v304_v40  ;;  %v362_v7 = vmul.f32 %v989_v43, %v820_v47  ;;  %v363_v35 = vmul.f32 %v989_v43, %v828_v54 }
  0x8a   :  { %471 = vst [vmem:[#allocation10 + $0x80] sm:$0xff] %v464_v13  ;;  %v364_v50 = vmul.f32 %v360_v63, %v950_v48  ;;  %473 = vst [vmem:[#allocation10 + $0x88] sm:$0xff] %v467_v12  ;;  %v311_v51 = vadd.f32 %v310_v59, %v309_v1  ;;  %v474_v36 = vmul.f32 0.21566555, %v304_v40  ;;  %v365_v34 = vmul.f32 %v361_v9, %v944_v44  ;;  %v499_v13 = vld [vmem:[#allocation8 + $0x38] sm:$0xff] }
  0x8b   :  { %v371_v52 = vmul.f32 %v361_v9, %v950_v48  ;;  %v482_v24 = vadd.f32 %v481_v8, %v480_v17  ;;  %v372_v61 = vmul.f32 %v360_v63, %v944_v44  ;;  %v374_v62 = vmul.f32 %v363_v35, %v956_v53 }
  0x8c   :  { %v290_v6 = vsub.f32 %v288_v3, %v289_v30  ;;  %v475_v46 = vmul.f32 0.4313311, %v311_v51  ;;  %v477_v47 = vmul.f32 -1.9409899, %v311_v51  ;;  %v366_v19 = vsub.f32 %v364_v50, %v365_v34 }
  0x8d   :  { %v484_v31 = vmul.f32 %v482_v24, %v304_v40  ;;  %v367_v54 = vmul.f32 %v362_v7, %v956_v53  ;;  %v373_v43 = vadd.f32 %v372_v61, %v371_v52  ;;  %v490_v39 = vmul.f32 %v482_v24, %v297_v5 }
  0x8e   :  { %v476_v16 = vadd.f32 %v475_v46, %v474_v36  ;;  %v479_v2 = vadd.f32 %v478_v28, %v477_v47  ;;  %v378_v23 = vmul.f32 %v362_v7, %v950_v48  ;;  %v376_v29 = vmul.f32 %v362_v7, %v969_v15 }
  0x8f   :  { %v375_v25 = vadd.f32 %v374_v62, %v373_v43  ;;  %v379_v0 = vmul.f32 %v363_v35, %v944_v44  ;;  %v381_v33 = vmul.f32 %v360_v63, %v956_v53  ;;  %v493_v26 = vmul.f32 %v482_v24, %v290_v6 }
  0x90   :  { %v483_v30 = vmul.f32 %v476_v16, %v290_v6  ;;  %v485_v18 = vmul.f32 %v479_v2, %v311_v51  ;;  %v488_v10 = vmul.f32 %v479_v2, %v290_v6  ;;  %v489_v41 = vmul.f32 %v476_v16, %v311_v51 }
  0x91   :  { %v494_v45 = vmul.f32 %v479_v2, %v297_v5  ;;  %v495_v4 = vmul.f32 %v476_v16, %v304_v40  ;;  %v383_v22 = vmul.f32 %v361_v9, %v969_v15  ;;  %v380_v42 = vsub.f32 %v378_v23, %v379_v0 }
  0x92   :  { %v486_v49 = vsub.f32 %v484_v31, %v485_v18  ;;  %v491_v3 = vsub.f32 %v489_v41, %v490_v39  ;;  %v385_v55 = vmul.f32 %v363_v35, %v950_v48  ;;  %v377_v14 = vsub.f32 %v375_v25, %v376_v29 }
  0x93   :  { %v496_v20 = vsub.f32 %v494_v45, %v495_v4  ;;  %v386_v58 = vmul.f32 %v362_v7, %v944_v44  ;;  %v388_v32 = vmul.f32 %v361_v9, %v956_v53  ;;  %v382_v11 = vadd.f32 %v381_v33, %v380_v42 }
  0x94   :  { %v487_v56 = vadd.f32 %v486_v49, %v483_v30  ;;  %v492_v59 = vadd.f32 %v491_v3, %v488_v10  ;;  %v369_v5 = vmul.f32 %v363_v35, %v969_v15  ;;  %v390_v1 = vmul.f32 %v360_v63, %v969_v15 }
  0x95   :  { %v497_v12 = vadd.f32 %v496_v20, %v493_v26  ;;  %v387_v40 = vadd.f32 %v386_v58, %v385_v55  ;;  %v368_v8 = vsub.f32 %v366_v19, %v367_v54  ;;  %v384_v48 = vadd.f32 %v383_v22, %v382_v11 }
  0x96   :  { %v500_v28 = vadd.f32 -0.9704949, %v487_v56  ;;  %v503_v17 = vadd.f32 -0.21566555, %v492_v59  ;;  %v519_v36 = vmul.f32 1.8726584, %v377_v14 }
  0x97   :  { %v506_v50 = vadd.f32 0.107832775, %v497_v12  ;;  %v389_v51 = vsub.f32 %v387_v40, %v388_v32  ;;  %v518_v53 = vmul.f32 0.7022469, %v377_v14  ;;  %v515_v52 = vmul.f32 -0.7022469, %v384_v48 }
  0x98   :  { %v501_v44 = vmul.f32 %v500_v28, %v499_v13  ;;  %v504_v7 = vmul.f32 %v503_v17, %v499_v13  ;;  %v521_v24 = vmul.f32 %v519_v36, %v384_v48  ;;  %v370_v62 = vsub.f32 %v368_v8, %v369_v5 }
  0x99   :  { %v507_v9 = vmul.f32 %v506_v50, %v499_v13  ;;  %v391_v34 = vadd.f32 %v390_v1, %v389_v51  ;;  %v527_v31 = vmul.f32 %v519_v36, %v377_v14  ;;  %v531_v19 = vmul.f32 %v518_v53, %v377_v14 }
  0x9a   :  { %v502_v61 = vadd.f32 %v501_v44, %v934_v37  ;;  %v505_v35 = vadd.f32 %v504_v7, %v937_v38  ;;  %v525_v54 = vmul.f32 %v518_v53, %v370_v62  ;;  %v530_v2 = vmul.f32 %v519_v36, %v370_v62  ;;  %v536_v37 = vld [vmem:[#allocation8 + $0x18] sm:$0xff] }
  0x9b   :  { %v508_v15 = vadd.f32 %v507_v9, %v920_v60  ;;  %v516_v63 = vmul.f32 -1.8726584, %v391_v34  ;;  %v522_v6 = vmul.f32 %v518_v53, %v391_v34 }
  0x9c   :  { %510 = vst [vmem:[#allocation10 + $0xa8] sm:$0xff] %v502_v61  ;;  %512 = vst [vmem:[#allocation10 + $0xb0] sm:$0xff] %v505_v35 }
  0x9d   :  { %514 = vst [vmem:[#allocation10 + $0xb8] sm:$0xff] %v508_v15  ;;  %v517_v46 = vadd.f32 %v516_v63, %v515_v52  ;;  %v523_v47 = vsub.f32 %v521_v24, %v522_v6 }
  0x9f   :  { %v520_v43 = vmul.f32 %v517_v46, %v370_v62  ;;  %v526_v16 = vmul.f32 %v517_v46, %v391_v34  ;;  %v532_v39 = vmul.f32 %v517_v46, %v384_v48 }
  0xa1   :  { %v524_v23 = vadd.f32 %v523_v47, %v520_v43  ;;  %v528_v38 = vsub.f32 %v526_v16, %v527_v31  ;;  %v533_v25 = vsub.f32 %v531_v19, %v532_v39 }
  0xa3   :  { %v537_v29 = vmul.f32 %v536_v37, %v524_v23  ;;  %v529_v60 = vadd.f32 %v528_v38, %v525_v54  ;;  %v534_v0 = vadd.f32 %v533_v25, %v530_v2 }
  0xa5   :  { %v538_v33 = vadd.f32 %v537_v29, %v1007_v57  ;;  %v539_v30 = vadd.f32 0.9363292, %v529_v60  ;;  %v542_v18 = vadd.f32 -0.35112345, %v534_v0 }
  0xa7   :  { %546 = vst [vmem:[#allocation10 + $0x48] sm:$0xff] %v538_v33  ;;  %v540_v10 = vmul.f32 %v539_v30, %v536_v37  ;;  %v543_v41 = vmul.f32 %v542_v18, %v536_v37 }
  0xa9   :  { %v541_v26 = vadd.f32 %v540_v10, %v1010_v21  ;;  %v544_v45 = vadd.f32 %v543_v41, %v1013_v27 }
  0xab   :  { %548 = vst [vmem:[#allocation10 + $0x50] sm:$0xff] %v541_v26  ;;  %550 = vst [vmem:[#allocation10 + $0x58] sm:$0xff] %v544_v45 }
  0xac   :  { %678 = shalt.err (!%p675_p10)
}
  0xad   :  { %562 = dma.vmem_to_hbm [thread:$0]  %s557_s3, 3072, %s1080_s4, [#allocation4], %s697_s20, %s697_s20, %s698_s21  }
  0xae   :  { %693 = dma.done.wait [#allocation4], 3072  }
  0xaf   :  { %694 = vsyncadd [#allocation4], 4294964224 }
  0xb0   :  { %566 = vsyncpa [#allocation3], 1 }
  0xb1   :  { %567 = vsyncpa [#allocation6], 1 }
  0xb2   :  { %568 = vsyncpa [#allocation9], 1 }
  0xb3   :  { %569 = vsyncpa [#allocation4], 1 }

</bundles_post_ra>
